<compile_context>
chip_gen: v7x
topology: tpu7x:2x2x1
jax: 0.10.0
libtpu: 0.0.40
codegen_flags: <defaults>
</compile_context>

<pallas_src>
import jax
import jax.numpy as jnp
from jax.experimental import pallas as pl
from jax.experimental.pallas import tpu as pltpu


def _cdiv(a, b):
    return (a + b - 1) // b


def _round_up(n, m):
    return _cdiv(n, m) * m


def _default_use_bf16():
    # bf16 VPU/EUP only exists on v6e/v7x; on v5e and older, f32 is both tighter and
    # at least as fast for this kernel (the casts would be pure extra VALU work).
    try:
        kind = jax.devices()[0].device_kind.lower()
    except Exception:
        return True
    return not any(tag in kind for tag in ("v2", "v3", "v4", "v5"))


def mlp_kernel(x_ref, w1_ref, b1_ref, w2_ref, b2_ref, w3_ref, b3_ref, o_ref):
    """tanh(tanh(tanh(x@W1+b1)@W2+b2)@W3+b3); all intermediates stay in VMEM/vregs."""
    cdt = w1_ref.dtype            # MXU input dtype   (bf16 on v6e/v7x, f32 on v5e)
    adt = b1_ref.dtype            # layer-1/2 activation dtype (bf16 on v6e/v7x)
    x = x_ref[...].astype(cdt)
    # Layer 1 — f32 MXU accumulation; bias+tanh in `adt` (EUP is the binding unit).
    h = jnp.dot(x, w1_ref[...], preferred_element_type=jnp.float32)
    h = jnp.tanh(h.astype(adt) + b1_ref[...])
    # Layer 2
    h = jnp.dot(h.astype(cdt), w2_ref[...], preferred_element_type=jnp.float32)
    h = jnp.tanh(h.astype(adt) + b2_ref[...])
    # Layer 3 — kept in f32 for final accuracy; output store is lane-dense.
    h = jnp.dot(h.astype(cdt), w3_ref[...], preferred_element_type=jnp.float32)
    h = jnp.tanh(h + b3_ref[...])
    o_ref[...] = h.astype(o_ref.dtype)


def mlp_feature_extractor(x, params, *, tile_b=None, use_bf16=None, pack=None):
    """x: [B, num_inputs] f32. params: w1[ni,64] b1[1,64] w2[64,48] b2[1,48] w3[48,no] b3[1,no]."""
    B, ni = x.shape
    no = params["w3"].shape[1]
    if use_bf16 is None:
        use_bf16 = _default_use_bf16()
    if pack is None:
        # Pack 8 rows per sublane-row so every tensor (incl. the [*, no] output) is
        # lane-dense; only worthwhile while the packed widths stay small.
        pack = 8 if max(ni, no) <= 128 else 1
    align = 8 * pack              # f32 sublane (8) x row-packing factor

    # --- batch tiling: big tiles to amortize per-grid-step overhead, but keep >=4
    # steps when B allows (v7x megacore + double buffering); padding stays < ~1% of B.
    if tile_b is None:
        cap = 8192
        b_aligned = _round_up(B, align)
        n_tiles = max(_cdiv(b_aligned, cap), min(4, b_aligned // align))
        tile_b = _round_up(_cdiv(b_aligned, n_tiles), align)
    assert tile_b % align == 0, f"tile_b must be a multiple of {align}"
    grid = (_cdiv(B, tile_b),)
    Bp = grid[0] * tile_b
    if Bp != B:
        x = jnp.pad(x, ((0, Bp - B), (0, 0)))   # bounded small; sliced off at the end

    # --- dtypes: bf16 MXU inputs + bf16 layer-1/2 activations on v6e/v7x; f32 on v5e.
    cdt = jnp.bfloat16 if use_bf16 else jnp.float32   # matmul input dtype
    adt = cdt                                          # layer-1/2 activation dtype

    # --- lane-dense repack: x -> [Bp/pack, pack*ni] (free row-major reshape),
    # weights -> pack-way block-diagonal, biases -> lane-tiled.  Packed output row g,
    # lanes [no*j : no*(j+1)], holds the result for original row pack*g + j, so a
    # row-major reshape at the end restores the original row order exactly.
    def block_diag(w):            # [fin, fout] -> [pack*fin, pack*fout]
        return jnp.kron(jnp.eye(pack, dtype=w.dtype), w)

    w1 = block_diag(params["w1"]).astype(cdt)
    w2 = block_diag(params["w2"]).astype(cdt)
    w3 = block_diag(params["w3"]).astype(cdt)
    b1 = jnp.tile(params["b1"], (1, pack)).astype(adt)
    b2 = jnp.tile(params["b2"], (1, pack)).astype(adt)
    b3 = jnp.tile(params["b3"], (1, pack)).astype(jnp.float32)

    xp = x.reshape(Bp // pack, pack * ni)

    row = lambda i: (i, 0)        # batch-tiled
    rep = lambda i: (0, 0)        # weights/biases resident across the batch grid

    weight_bytes = sum(int(a.size) * a.dtype.itemsize for a in (w1, b1, w2, b2, w3, b3))
    cost = pl.CostEstimate(
        flops=2 * Bp * (ni * 64 + 64 * 48 + 48 * no),
        transcendentals=Bp * (64 + 48 + no),
        bytes_accessed=Bp * ni * x.dtype.itemsize + Bp * no * 4 + weight_bytes,
    )

    out = pl.pallas_call(
        mlp_kernel,
        out_shape=jax.ShapeDtypeStruct((Bp // pack, pack * no), jnp.float32),
        grid_spec=pltpu.PrefetchScalarGridSpec(
            num_scalar_prefetch=0,
            grid=grid,
            in_specs=[
                pl.BlockSpec((tile_b // pack, pack * ni), row),
                pl.BlockSpec(w1.shape, rep),
                pl.BlockSpec(b1.shape, rep),
                pl.BlockSpec(w2.shape, rep),
                pl.BlockSpec(b2.shape, rep),
                pl.BlockSpec(w3.shape, rep),
                pl.BlockSpec(b3.shape, rep),
            ],
            out_specs=pl.BlockSpec((tile_b // pack, pack * no), row),
        ),
        compiler_params=pltpu.CompilerParams(
            dimension_semantics=("parallel",),
        ),
        cost_estimate=cost,
    )(xp, w1, b1, w2, b2, w3, b3)

    return out.reshape(Bp, no)[:B]


def init_params(key, num_inputs, num_outputs):
    """Deterministic init mimicking nn.Linear's uniform(-1/sqrt(fan_in), 1/sqrt(fan_in))."""
    dims = [(num_inputs, 64), (64, 48), (48, num_outputs)]
    params = {}
    keys = jax.random.split(key, 2 * len(dims))
    for idx, (fan_in, fan_out) in enumerate(dims):
        bound = 1.0 / jnp.sqrt(jnp.float32(fan_in))
        w = jax.random.uniform(keys[2 * idx], (fan_in, fan_out), jnp.float32, -bound, bound)
        b = jax.random.uniform(keys[2 * idx + 1], (1, fan_out), jnp.float32, -bound, bound)
        params[f"w{idx + 1}"] = w
        params[f"b{idx + 1}"] = b
    return params


def reference_forward(x, params):
    h = jnp.tanh(x @ params["w1"] + params["b1"])
    h = jnp.tanh(h @ params["w2"] + params["b2"])
    h = jnp.tanh(h @ params["w3"] + params["b3"])
    return h


if __name__ == "__main__":
    num_inputs, num_outputs = 32, 16
    key = jax.random.PRNGKey(0)
    kx, kx2, kp = jax.random.split(key, 3)
    params = init_params(kp, num_inputs, num_outputs)

    # 1) Small batch, exact f32 path (matches the PyTorch module numerically).
    batch = 8
    x = jax.random.normal(kx, (batch, num_inputs), jnp.float32)
    out = mlp_feature_extractor(x, params, use_bf16=False)
    out = jax.block_until_ready(out)
    ref = reference_forward(x, params)
    assert out.shape == (batch, num_outputs)
    assert jnp.allclose(out, ref, atol=1e-5, rtol=1e-5)

    # 2) Ragged batch on the hardware-default dtype path (bf16 tanh on v6e/v7x,
    #    f32 on v5e): exercises tiling (grid=4), padding, and the pipelined DMA path.
    batch2 = 200  # -> padded to 256, tile_b=64, grid=4
    x2 = jax.random.normal(kx2, (batch2, num_inputs), jnp.float32)
    out2 = mlp_feature_extractor(x2, params)
    out2 = jax.block_until_ready(out2)
    ref2 = reference_forward(x2, params)
    assert out2.shape == (batch2, num_outputs)
    assert jnp.allclose(out2, ref2, atol=5e-2, rtol=5e-2)  # bf16 path -> looser tol

    print("KERNEL_OK")
</pallas_src>

<mosaic_0001>
module attributes {stable_mosaic.version = 11 : i64} {
  func.func @mlp_kernel(%arg0: i32, %arg1: memref<8x256xf32, #tpu.memory_space<vmem>>, %arg2: memref<256x512xf32, #tpu.memory_space<vmem>>, %arg3: memref<1x512xf32, #tpu.memory_space<vmem>>, %arg4: memref<512x384xf32, #tpu.memory_space<vmem>>, %arg5: memref<1x384xf32, #tpu.memory_space<vmem>>, %arg6: memref<384x128xf32, #tpu.memory_space<vmem>>, %arg7: memref<1x128xf32, #tpu.memory_space<vmem>>, %arg8: memref<8x128xf32, #tpu.memory_space<vmem>>) attributes {dimension_semantics = [#tpu.dimension_semantics<parallel>], iteration_bounds = array<i64: 1>, scalar_prefetch = 0 : i64, scratch_operands = 0 : i64, tpu.core_type = #tpu.core_type<tc>, window_params = [{transform_indices = @transform_0, window_bounds = array<i64: 8, 256>}, {pipeline_mode = #tpu.pipeline_mode<synchronous>, transform_indices = @transform_1, window_bounds = array<i64: 256, 512>}, {pipeline_mode = #tpu.pipeline_mode<synchronous>, transform_indices = @transform_2, window_bounds = array<i64: 1, 512>}, {pipeline_mode = #tpu.pipeline_mode<synchronous>, transform_indices = @transform_3, window_bounds = array<i64: 512, 384>}, {pipeline_mode = #tpu.pipeline_mode<synchronous>, transform_indices = @transform_4, window_bounds = array<i64: 1, 384>}, {pipeline_mode = #tpu.pipeline_mode<synchronous>, transform_indices = @transform_5, window_bounds = array<i64: 384, 128>}, {pipeline_mode = #tpu.pipeline_mode<synchronous>, transform_indices = @transform_6, window_bounds = array<i64: 1, 128>}, {transform_indices = @transform_7, window_bounds = array<i64: 8, 128>}]} {
    %c0 = arith.constant 0 : index
    %c0_0 = arith.constant 0 : index
    %0 = vector.load %arg1[%c0, %c0_0] : memref<8x256xf32, #tpu.memory_space<vmem>>, vector<8x256xf32>
    %c0_1 = arith.constant 0 : index
    %c0_2 = arith.constant 0 : index
    %1 = vector.load %arg2[%c0_1, %c0_2] : memref<256x512xf32, #tpu.memory_space<vmem>>, vector<256x512xf32>
    %cst = arith.constant dense<0.000000e+00> : vector<8x512xf32>
    %2 = tpu.matmul %0, %1, %cst {dimension_numbers = #tpu.dot_dimension_numbers<[1], [0], [0], [1], [0, 0, 1, 1], [], []>} : vector<8x256xf32>, vector<256x512xf32>, vector<8x512xf32> -> vector<8x512xf32>
    %c0_3 = arith.constant 0 : index
    %c0_4 = arith.constant 0 : index
    %3 = vector.load %arg3[%c0_3, %c0_4] : memref<1x512xf32, #tpu.memory_space<vmem>>, vector<1x512xf32>
    %4 = vector.broadcast %3 : vector<1x512xf32> to vector<8x512xf32>
    %5 = arith.addf %2, %4 : vector<8x512xf32>
    %6 = math.tanh %5 : vector<8x512xf32>
    %c0_5 = arith.constant 0 : index
    %c0_6 = arith.constant 0 : index
    %7 = vector.load %arg4[%c0_5, %c0_6] : memref<512x384xf32, #tpu.memory_space<vmem>>, vector<512x384xf32>
    %cst_7 = arith.constant dense<0.000000e+00> : vector<8x384xf32>
    %8 = tpu.matmul %6, %7, %cst_7 {dimension_numbers = #tpu.dot_dimension_numbers<[1], [0], [0], [1], [0, 0, 1, 1], [], []>} : vector<8x512xf32>, vector<512x384xf32>, vector<8x384xf32> -> vector<8x384xf32>
    %c0_8 = arith.constant 0 : index
    %c0_9 = arith.constant 0 : index
    %9 = vector.load %arg5[%c0_8, %c0_9] : memref<1x384xf32, #tpu.memory_space<vmem>>, vector<1x384xf32>
    %10 = vector.broadcast %9 : vector<1x384xf32> to vector<8x384xf32>
    %11 = arith.addf %8, %10 : vector<8x384xf32>
    %12 = math.tanh %11 : vector<8x384xf32>
    %c0_10 = arith.constant 0 : index
    %c0_11 = arith.constant 0 : index
    %13 = vector.load %arg6[%c0_10, %c0_11] : memref<384x128xf32, #tpu.memory_space<vmem>>, vector<384x128xf32>
    %cst_12 = arith.constant dense<0.000000e+00> : vector<8x128xf32>
    %14 = tpu.matmul %12, %13, %cst_12 {dimension_numbers = #tpu.dot_dimension_numbers<[1], [0], [0], [1], [0, 0, 1, 1], [], []>} : vector<8x384xf32>, vector<384x128xf32>, vector<8x128xf32> -> vector<8x128xf32>
    %c0_13 = arith.constant 0 : index
    %c0_14 = arith.constant 0 : index
    %15 = vector.load %arg7[%c0_13, %c0_14] : memref<1x128xf32, #tpu.memory_space<vmem>>, vector<1x128xf32>
    %16 = vector.broadcast %15 : vector<1x128xf32> to vector<8x128xf32>
    %17 = arith.addf %14, %16 : vector<8x128xf32>
    %18 = math.tanh %17 : vector<8x128xf32>
    %c0_15 = arith.constant 0 : index
    %c0_16 = arith.constant 0 : index
    %19 = vector.load %arg8[%c0_15, %c0_16] : memref<8x128xf32, #tpu.memory_space<vmem>>, vector<8x128xf32>
    tpu.vector_store %arg8[%c0_15, %c0_16], %18 {strides = array<i32>} : memref<8x128xf32, #tpu.memory_space<vmem>>, vector<8x128xf32>,
    return
  }
  func.func @transform_0(%arg0: i32) -> (i32, i32) {
    %c0_i32 = arith.constant 0 : i32
    %c0_i32_0 = arith.constant 0 : i32
    return %arg0, %c0_i32 : i32, i32
  }
  func.func @transform_1(%arg0: i32) -> (i32, i32) {
    %c0_i32 = arith.constant 0 : i32
    %c0_i32_0 = arith.constant 0 : i32
    %c0_i32_1 = arith.constant 0 : i32
    return %c0_i32, %c0_i32_0 : i32, i32
  }
  func.func @transform_2(%arg0: i32) -> (i32, i32) {
    %c0_i32 = arith.constant 0 : i32
    %c0_i32_0 = arith.constant 0 : i32
    %c0_i32_1 = arith.constant 0 : i32
    return %c0_i32, %c0_i32_0 : i32, i32
  }
  func.func @transform_3(%arg0: i32) -> (i32, i32) {
    %c0_i32 = arith.constant 0 : i32
    %c0_i32_0 = arith.constant 0 : i32
    %c0_i32_1 = arith.constant 0 : i32
    return %c0_i32, %c0_i32_0 : i32, i32
  }
  func.func @transform_4(%arg0: i32) -> (i32, i32) {
    %c0_i32 = arith.constant 0 : i32
    %c0_i32_0 = arith.constant 0 : i32
    %c0_i32_1 = arith.constant 0 : i32
    return %c0_i32, %c0_i32_0 : i32, i32
  }
  func.func @transform_5(%arg0: i32) -> (i32, i32) {
    %c0_i32 = arith.constant 0 : i32
    %c0_i32_0 = arith.constant 0 : i32
    %c0_i32_1 = arith.constant 0 : i32
    return %c0_i32, %c0_i32_0 : i32, i32
  }
  func.func @transform_6(%arg0: i32) -> (i32, i32) {
    %c0_i32 = arith.constant 0 : i32
    %c0_i32_0 = arith.constant 0 : i32
    %c0_i32_1 = arith.constant 0 : i32
    return %c0_i32, %c0_i32_0 : i32, i32
  }
  func.func @transform_7(%arg0: i32) -> (i32, i32) {
    %c0_i32 = arith.constant 0 : i32
    %c0_i32_0 = arith.constant 0 : i32
    return %arg0, %c0_i32 : i32, i32
  }
}

</mosaic_0001>

<bundles_post_ra>
// kernel: tpu_custom_call.1
= control target key start
LH: loop header
LB: loop body
LE: loop exit
PB: predicated region body
PF: predicated region fallthrough
CT: control target
= control target key end

     0   :  { %12 = vsyncpa [#allocation3], 0  ;;  %s1934_s0 = inlined_call_operand.hbm [shape: f32[8,256], index: 0, kind: input, shape index: {}]   ;;  %s1935_s1 = inlined_call_operand.hbm [shape: f32[256,512], index: 1, kind: input, shape index: {}]   ;;  %s1936_s2 = inlined_call_operand.vmem [shape: f32[1,512], index: 2, kind: input, shape index: {}]   ;;  %s1937_s3 = inlined_call_operand.hbm [shape: f32[512,384], index: 3, kind: input, shape index: {}]   ;;  %s1938_s4 = inlined_call_operand.vmem [shape: f32[1,384], index: 4, kind: input, shape index: {}]   ;;  %s1939_s5 = inlined_call_operand.hbm [shape: f32[384,128], index: 5, kind: input, shape index: {}]   ;;  %s1940_s6 = inlined_call_operand.vmem [shape: f32[1,128], index: 6, kind: input, shape index: {}]   ;;  %s1941_s7 = inlined_call_operand.hbm [shape: f32[8,128], index: 7, kind: output, shape index: {}]  }
   0x1   :  { %13 = vsyncpa [#allocation6], 0 }
   0x2   :  { %14 = vsyncpa [#allocation9], 0 }
   0x3   :  { %15 = vsyncpa [#allocation4], 0  ;;  %s1772_s24 = smov [#allocation5]   ;;  %s1654_s28 = scalar_lea.hbm %s1935_s1, 16384 }
   0x4   :  { %s31_s25 = sshll.u32 %s1772_s24, 4  ;;  %p1655_p0 = scmp.ne.s32.totalorder %s1935_s1, %s1654_s28  ;;  %s32_s25 = int_to_ptr.vmem [resolvable:$true] %s31_s25 }
   0x5   :  { %p1658_p1 = scmp.lt.u32.totalorder %s1654_s28, %s1935_s1 }
   0x7   :  { %p1660_p2 = pnand %p1658_p1, %p1655_p0 }
   0x9   :  { %1663 = shalt.err (!%p1660_p2)
}
   0xa   :  { %s1664_s10 = scalar_lea.vmem %s32_s25, 16384  ;;  %p1669_p4 = scmp.lt.s32.totalorder %s32_s25, %s32_s25 }
   0xb   :  { %p1665_p3 = scmp.ne.s32.totalorder %s32_s25, %s1664_s10  ;;  %p1670_p5 = scmp.lt.s32.totalorder %s1664_s10, %s1664_s10 }
   0xd   :  { %p1671_p6 = por %p1670_p5, %p1669_p4 }
   0xf   :  { %p1672_p7 = pnand %p1671_p6, %p1665_p3 }
  0x11   :  { %1675 = shalt.err (!%p1672_p7)
}
  0x12   :  { %s1773_s11 = smov 512   ;;  %s1774_s12 = smov 32  }
  0x13   :  { %37 = dma.hbm_to_vmem [thread:$0]  %s1935_s1, 16384, %s32_s25, [#allocation6], %s1773_s11, %s1773_s11, %s1774_s12  }
  0x14   :  { %s1775_s15 = smov [#allocation2]   ;;  %s1776_s17 = smov [#allocation7]  }
  0x15   :  { %s22_s16 = sshll.u32 %s1775_s15, 4  ;;  %s45_s18 = sshll.u32 %s1776_s17, 4  ;;  %s23_s16 = int_to_ptr.vmem [resolvable:$true] %s22_s16  ;;  %s46_s18 = int_to_ptr.vmem [resolvable:$true] %s45_s18 }
  0x16   :  { %s1676_s21 = scalar_lea.hbm %s1934_s0, 256 }
  0x17   :  { %p1677_p8 = scmp.ne.s32.totalorder %s1934_s0, %s1676_s21  ;;  %p1680_p9 = scmp.lt.u32.totalorder %s1676_s21, %s1934_s0 }
  0x19   :  { %p1682_p10 = pnand %p1680_p9, %p1677_p8 }
  0x1b   :  { %1685 = shalt.err (!%p1682_p10)
}
  0x1c   :  { %s1686_s1 = scalar_lea.vmem %s23_s16, 256  ;;  %p1691_p12 = scmp.lt.s32.totalorder %s23_s16, %s23_s16 }
  0x1d   :  { %p1687_p11 = scmp.ne.s32.totalorder %s23_s16, %s1686_s1  ;;  %p1692_p13 = scmp.lt.s32.totalorder %s1686_s1, %s1686_s1 }
  0x1f   :  { %p1693_p0 = por %p1692_p13, %p1691_p12 }
  0x21   :  { %p1694_p1 = pnand %p1693_p0, %p1687_p11 }
  0x23   :  { %1697 = shalt.err (!%p1694_p1)
}
  0x24   :  { %25 = dma.hbm_to_vmem [thread:$0]  %s1934_s0, 256, %s23_s16, [#allocation3]  }
  0x25   :  { %s1698_s30 = scalar_lea.hbm %s1937_s3, 24576 }
  0x26   :  { %p1699_p2 = scmp.ne.s32.totalorder %s1937_s3, %s1698_s30  ;;  %p1702_p3 = scmp.lt.u32.totalorder %s1698_s30, %s1937_s3 }
  0x28   :  { %p1704_p4 = pnand %p1702_p3, %p1699_p2 }
  0x2a   :  { %1707 = shalt.err (!%p1704_p4)
}
  0x2b   :  { %s1708_s12 = scalar_lea.vmem %s46_s18, 24576  ;;  %p1713_p6 = scmp.lt.s32.totalorder %s46_s18, %s46_s18 }
  0x2c   :  { %p1709_p5 = scmp.ne.s32.totalorder %s46_s18, %s1708_s12  ;;  %p1714_p7 = scmp.lt.s32.totalorder %s1708_s12, %s1708_s12 }
  0x2e   :  { %p1715_p8 = por %p1714_p7, %p1713_p6 }
  0x30   :  { %p1716_p9 = pnand %p1715_p8, %p1709_p5 }
  0x32   :  { %1719 = shalt.err (!%p1716_p9)
}
  0x33   :  { %s1777_s0 = smov 384   ;;  %s1778_s13 = smov 24  }
  0x34   :  { %51 = dma.hbm_to_vmem [thread:$0]  %s1937_s3, 24576, %s46_s18, [#allocation6], %s1777_s0, %s1777_s0, %s1778_s13  }
  0x35   :  { %s1779_s16 = smov [#allocation8]   ;;  %s1720_s21 = scalar_lea.hbm %s1939_s5, 6144 }
  0x36   :  { %s59_s17 = sshll.u32 %s1779_s16, 4  ;;  %p1721_p10 = scmp.ne.s32.totalorder %s1939_s5, %s1720_s21  ;;  %s60_s17 = int_to_ptr.vmem [resolvable:$true] %s59_s17 }
  0x37   :  { %p1724_p11 = scmp.lt.u32.totalorder %s1720_s21, %s1939_s5 }
  0x39   :  { %p1726_p12 = pnand %p1724_p11, %p1721_p10 }
  0x3b   :  { %1729 = shalt.err (!%p1726_p12)
}
  0x3c   :  { %s1730_s1 = scalar_lea.vmem %s60_s17, 6144  ;;  %p1735_p0 = scmp.lt.s32.totalorder %s60_s17, %s60_s17 }
  0x3d   :  { %p1731_p13 = scmp.ne.s32.totalorder %s60_s17, %s1730_s1  ;;  %p1736_p1 = scmp.lt.s32.totalorder %s1730_s1, %s1730_s1 }
  0x3f   :  { %p1737_p2 = por %p1736_p1, %p1735_p0 }
  0x41   :  { %p1738_p3 = pnand %p1737_p2, %p1731_p13 }
  0x43   :  { %1741 = shalt.err (!%p1738_p3)
}
  0x44   :  { %s1780_s3 = smov 128   ;;  %s1781_s18 = smov 8  }
  0x45   :  { %65 = dma.hbm_to_vmem [thread:$0]  %s1939_s5, 6144, %s60_s17, [#allocation9], %s1780_s3, %s1780_s3, %s1781_s18  }
  0x46   :  { %1764 = dma.done.wait [#allocation3], 256  }
  0x47   :  { %1765 = vsyncadd [#allocation3], 4294967040 }
  0x48   :  { %1766 = dma.done.wait [#allocation6], 40960  }
  0x49   :  { %1767 = vsyncadd [#allocation6], 4294926336 }
  0x4a   :  { %1768 = dma.done.wait [#allocation9], 6144  }
  0x4b   :  { %1769 = vsyncadd [#allocation9], 4294961152  ;;  %v83_v0 = vld [vmem:[#allocation5 + $0x8] sm:$0xff]  ;;  %v82_v2 = vld [vmem:[#allocation5] sm:$0xff]  ;;  %vm1783_vm0 = vmmov 0   ;;  %s1785_s8 = smov [#allocation10]  }
  0x4c   :  { %v87_v1 = vld [vmem:[#allocation5 + $0x28] sm:$0xff]  ;;  %v86_v4 = vld [vmem:[#allocation5 + $0x20] sm:$0xff]  ;;  %v85_v25 = vld [vmem:[#allocation5 + $0x18] sm:$0xff]  ;;  %s1075_s9 = sshll.u32 %s1785_s8, 4  ;;  %s1076_s9 = int_to_ptr.vmem [resolvable:$true] %s1075_s9 }
  0x4d   :  { %v1244_v3 = vpack.c.bf16 %v87_v1, %v83_v0  ;;  %v91_v5 = vld [vmem:[#allocation5 + $0x48] sm:$0xff]  ;;  %v1246_v7 = vpack.c.bf16 %v86_v4, %v82_v2  ;;  %v90_v9 = vld [vmem:[#allocation5 + $0x40] sm:$0xff]  ;;  %v89_v26 = vld [vmem:[#allocation5 + $0x38] sm:$0xff]  ;;  %s1742_s10 = scalar_lea.vmem %s1076_s9, 128  ;;  %p1747_p5 = scmp.lt.s32.totalorder %s1076_s9, %s1076_s9 }
  0x4e   :  { %v95_v6 = vld [vmem:[#allocation5 + $0x68] sm:$0xff]  ;;  %v94_v10 = vld [vmem:[#allocation5 + $0x60] sm:$0xff]  ;;  %v1308_v29 = vpack.c.bf16 %v89_v26, %v85_v25  ;;  %v84_v30 = vld [vmem:[#allocation5 + $0x10] sm:$0xff]  ;;  %p1743_p4 = scmp.ne.s32.totalorder %s1076_s9, %s1742_s10  ;;  %p1748_p6 = scmp.lt.s32.totalorder %s1742_s10, %s1742_s10 }
  0x4f   :  { %v1248_v8 = vpack.c.bf16 %v95_v6, %v91_v5  ;;  %v99_v11 = vld [vmem:[#allocation5 + $0x88] sm:$0xff]  ;;  %1245 = vmatprep.subr.bf16.mxu0 %v1244_v3  ;;  %v1250_v13 = vpack.c.bf16 %v94_v10, %v90_v9  ;;  %v98_v15 = vld [vmem:[#allocation5 + $0x80] sm:$0xff]  ;;  %v88_v31 = vld [vmem:[#allocation5 + $0x30] sm:$0xff] }
  0x50   :  { %v103_v12 = vld [vmem:[#allocation5 + $0xa8] sm:$0xff]  ;;  %1247 = vmatpush1.bf16.msra.mxu0 %v1246_v7  ;;  %v102_v16 = vld [vmem:[#allocation5 + $0xa0] sm:$0xff]  ;;  %v1310_v34 = vpack.c.bf16 %v88_v31, %v84_v30  ;;  %v93_v35 = vld [vmem:[#allocation5 + $0x58] sm:$0xff]  ;;  %1309 = vmatprep.subr.bf16.mxu1 %v1308_v29  ;;  %p1749_p7 = por %p1748_p6, %p1747_p5 }
  0x51   :  { %1249 = vmatprep.subr.bf16.mxu0 %v1248_v8  ;;  %v1252_v14 = vpack.c.bf16 %v103_v12, %v99_v11  ;;  %v107_v17 = vld [vmem:[#allocation5 + $0xc8] sm:$0xff]  ;;  %v1254_v19 = vpack.c.bf16 %v102_v16, %v98_v15  ;;  %v106_v21 = vld [vmem:[#allocation5 + $0xc0] sm:$0xff]  ;;  %v97_v36 = vld [vmem:[#allocation5 + $0x78] sm:$0xff] }
  0x52   :  { %v111_v18 = vld [vmem:[#allocation5 + $0xe8] sm:$0xff]  ;;  %v110_v22 = vld [vmem:[#allocation5 + $0xe0] sm:$0xff]  ;;  %v1312_v39 = vpack.c.bf16 %v97_v36, %v93_v35  ;;  %v92_v40 = vld [vmem:[#allocation5 + $0x50] sm:$0xff]  ;;  %1311 = vmatpush1.bf16.msra.mxu1 %v1310_v34  ;;  %p1750_p8 = pnand %p1749_p7, %p1743_p4 }
  0x53   :  { %v1256_v20 = vpack.c.bf16 %v111_v18, %v107_v17  ;;  %v115_v23 = vld [vmem:[#allocation5 + $0x108] sm:$0xff]  ;;  %v1258_v27 = vpack.c.bf16 %v110_v22, %v106_v21  ;;  %v114_v28 = vld [vmem:[#allocation5 + $0x100] sm:$0xff]  ;;  %v96_v41 = vld [vmem:[#allocation5 + $0x70] sm:$0xff] }
  0x54   :  { %1251 = vmatpush1.bf16.msra.mxu0 %v1250_v13  ;;  %v119_v24 = vld [vmem:[#allocation5 + $0x128] sm:$0xff]  ;;  %v118_v33 = vld [vmem:[#allocation5 + $0x120] sm:$0xff]  ;;  %1313 = vmatprep.subr.bf16.mxu1 %v1312_v39  ;;  %v1314_v44 = vpack.c.bf16 %v96_v41, %v92_v40  ;;  %v101_v45 = vld [vmem:[#allocation5 + $0x98] sm:$0xff] }
  0x55   :  { %1253 = vmatprep.subr.bf16.mxu0 %v1252_v14  ;;  %v1260_v32 = vpack.c.bf16 %v119_v24, %v115_v23  ;;  %v123_v37 = vld [vmem:[#allocation5 + $0x148] sm:$0xff]  ;;  %v1262_v42 = vpack.c.bf16 %v118_v33, %v114_v28  ;;  %v122_v43 = vld [vmem:[#allocation5 + $0x140] sm:$0xff]  ;;  %v105_v46 = vld [vmem:[#allocation5 + $0xb8] sm:$0xff] }
  0x56   :  { %v127_v38 = vld [vmem:[#allocation5 + $0x168] sm:$0xff]  ;;  %v126_v48 = vld [vmem:[#allocation5 + $0x160] sm:$0xff]  ;;  %v1316_v49 = vpack.c.bf16 %v105_v46, %v101_v45  ;;  %v100_v50 = vld [vmem:[#allocation5 + $0x90] sm:$0xff]  ;;  %1315 = vmatpush1.bf16.msra.mxu1 %v1314_v44 }
  0x57   :  { %v1264_v47 = vpack.c.bf16 %v127_v38, %v123_v37  ;;  %v104_v51 = vld [vmem:[#allocation5 + $0xb0] sm:$0xff]  ;;  %v131_v52 = vld [vmem:[#allocation5 + $0x188] sm:$0xff]  ;;  %v109_v54 = vld [vmem:[#allocation5 + $0xd8] sm:$0xff]  ;;  %v1266_v57 = vpack.c.bf16 %v126_v48, %v122_v43 }
  0x58   :  { %1255 = vmatpush1.bf16.msra.mxu0 %v1254_v19  ;;  %v135_v53 = vld [vmem:[#allocation5 + $0x1a8] sm:$0xff]  ;;  %v1318_v55 = vpack.c.bf16 %v104_v51, %v100_v50  ;;  %v113_v56 = vld [vmem:[#allocation5 + $0xf8] sm:$0xff]  ;;  %v130_v58 = vld [vmem:[#allocation5 + $0x180] sm:$0xff]  ;;  %1317 = vmatprep.subr.bf16.mxu1 %v1316_v49 }
  0x59   :  { %1257 = vmatprep.subr.bf16.mxu0 %v1256_v20  ;;  %v1320_v59 = vpack.c.bf16 %v113_v56, %v109_v54  ;;  %v108_v60 = vld [vmem:[#allocation5 + $0xd0] sm:$0xff]  ;;  %v1268_v62 = vpack.c.bf16 %v135_v53, %v131_v52  ;;  %v134_v63 = vld [vmem:[#allocation5 + $0x1a0] sm:$0xff]  ;;  %v117_v0 = vld [vmem:[#allocation5 + $0x118] sm:$0xff] }
  0x5a   :  { %v112_v61 = vld [vmem:[#allocation5 + $0xf0] sm:$0xff]  ;;  %v121_v1 = vld [vmem:[#allocation5 + $0x138] sm:$0xff]  ;;  %v139_v2 = vld [vmem:[#allocation5 + $0x1c8] sm:$0xff]  ;;  %1319 = vmatpush1.bf16.msra.mxu1 %v1318_v55  ;;  %v1270_v5 = vpack.c.bf16 %v134_v63, %v130_v58 }
  0x5b   :  { %v143_v3 = vld [vmem:[#allocation5 + $0x1e8] sm:$0xff]  ;;  %v1322_v4 = vpack.c.bf16 %v112_v61, %v108_v60  ;;  %v138_v6 = vld [vmem:[#allocation5 + $0x1c0] sm:$0xff]  ;;  %1321 = vmatprep.subr.bf16.mxu1 %v1320_v59  ;;  %v1324_v7 = vpack.c.bf16 %v121_v1, %v117_v0  ;;  %v116_v8 = vld [vmem:[#allocation5 + $0x110] sm:$0xff] }
  0x5c   :  { %1259 = vmatpush1.bf16.msra.mxu0 %v1258_v27  ;;  %v120_v9 = vld [vmem:[#allocation5 + $0x130] sm:$0xff]  ;;  %v1272_v10 = vpack.c.bf16 %v143_v3, %v139_v2  ;;  %v142_v11 = vld [vmem:[#allocation5 + $0x1e0] sm:$0xff]  ;;  %v125_v12 = vld [vmem:[#allocation5 + $0x158] sm:$0xff] }
  0x5d   :  { %1261 = vmatprep.subr.bf16.mxu0 %v1260_v32  ;;  %v129_v13 = vld [vmem:[#allocation5 + $0x178] sm:$0xff]  ;;  %v147_v14 = vld [vmem:[#allocation5 + $0x208] sm:$0xff]  ;;  %v1326_v16 = vpack.c.bf16 %v120_v9, %v116_v8  ;;  %v1274_v17 = vpack.c.bf16 %v142_v11, %v138_v6  ;;  %v146_v18 = vld [vmem:[#allocation5 + $0x200] sm:$0xff] }
  0x5e   :  { %v151_v15 = vld [vmem:[#allocation5 + $0x228] sm:$0xff]  ;;  %1323 = vmatpush1.bf16.msra.mxu1 %v1322_v4  ;;  %v1328_v19 = vpack.c.bf16 %v129_v13, %v125_v12  ;;  %v124_v20 = vld [vmem:[#allocation5 + $0x150] sm:$0xff]  ;;  %v150_v23 = vld [vmem:[#allocation5 + $0x220] sm:$0xff] }
  0x5f   :  { %1325 = vmatprep.subr.bf16.mxu1 %v1324_v7  ;;  %v128_v21 = vld [vmem:[#allocation5 + $0x170] sm:$0xff]  ;;  %v1276_v22 = vpack.c.bf16 %v151_v15, %v147_v14  ;;  %v133_v24 = vld [vmem:[#allocation5 + $0x198] sm:$0xff]  ;;  %v155_v26 = vld [vmem:[#allocation5 + $0x248] sm:$0xff]  ;;  %v1278_v30 = vpack.c.bf16 %v150_v23, %v146_v18 }
  0x60   :  { %1263 = vmatpush1.bf16.msra.mxu0 %v1262_v42  ;;  %v137_v25 = vld [vmem:[#allocation5 + $0x1b8] sm:$0xff]  ;;  %v159_v27 = vld [vmem:[#allocation5 + $0x268] sm:$0xff]  ;;  %v154_v28 = vld [vmem:[#allocation5 + $0x240] sm:$0xff]  ;;  %v1330_v29 = vpack.c.bf16 %v128_v21, %v124_v20 }
  0x61   :  { %1265 = vmatprep.subr.bf16.mxu0 %v1264_v47  ;;  %v1332_v31 = vpack.c.bf16 %v137_v25, %v133_v24  ;;  %v132_v32 = vld [vmem:[#allocation5 + $0x190] sm:$0xff]  ;;  %v81_v34 = vld [vmem:[#allocation2 + $0x8] sm:$0xff]  ;;  %v1280_v35 = vpack.c.bf16 %v159_v27, %v155_v26  ;;  %v158_v36 = vld [vmem:[#allocation5 + $0x260] sm:$0xff] }
  0x62   :  { %1327 = vmatpush1.bf16.msra.mxu1 %v1326_v16  ;;  %v136_v33 = vld [vmem:[#allocation5 + $0x1b0] sm:$0xff]  ;;  %v141_v37 = vld [vmem:[#allocation5 + $0x1d8] sm:$0xff]  ;;  %296 = vmatprep.mubr.f32.mxu0 %v81_v34  ;;  %v163_v39 = vld [vmem:[#allocation5 + $0x288] sm:$0xff]  ;;  %v1282_v42 = vpack.c.bf16 %v158_v36, %v154_v28 }
  0x63   :  { %1329 = vmatprep.subr.bf16.mxu1 %v1328_v19  ;;  %v145_v38 = vld [vmem:[#allocation5 + $0x1f8] sm:$0xff]  ;;  %v167_v40 = vld [vmem:[#allocation5 + $0x2a8] sm:$0xff]  ;;  %367 = vmatprep.mubr.f32.mxu1 %v81_v34  ;;  %v1334_v41 = vpack.c.bf16 %v136_v33, %v132_v32  ;;  %v162_v43 = vld [vmem:[#allocation5 + $0x280] sm:$0xff] }
  0x64   :  { %1267 = vmatpush1.bf16.msra.mxu0 %v1266_v57  ;;  %v1336_v44 = vpack.c.bf16 %v145_v38, %v141_v37  ;;  %v140_v45 = vld [vmem:[#allocation5 + $0x1d0] sm:$0xff]  ;;  %v1284_v47 = vpack.c.bf16 %v167_v40, %v163_v39  ;;  %v166_v48 = vld [vmem:[#allocation5 + $0x2a0] sm:$0xff]  ;;  %v149_v49 = vld [vmem:[#allocation5 + $0x218] sm:$0xff] }
  0x65   :  { %1269 = vmatprep.subr.bf16.mxu0 %v1268_v62  ;;  %v144_v46 = vld [vmem:[#allocation5 + $0x1f0] sm:$0xff]  ;;  %v153_v50 = vld [vmem:[#allocation5 + $0x238] sm:$0xff]  ;;  %v171_v51 = vld [vmem:[#allocation5 + $0x2c8] sm:$0xff]  ;;  %v1286_v54 = vpack.c.bf16 %v166_v48, %v162_v43 }
  0x66   :  { %1331 = vmatpush1.bf16.msra.mxu1 %v1330_v29  ;;  %v175_v52 = vld [vmem:[#allocation5 + $0x2e8] sm:$0xff]  ;;  %v1338_v53 = vpack.c.bf16 %v144_v46, %v140_v45  ;;  %v170_v55 = vld [vmem:[#allocation5 + $0x2c0] sm:$0xff]  ;;  %v1340_v56 = vpack.c.bf16 %v153_v50, %v149_v49  ;;  %v148_v57 = vld [vmem:[#allocation5 + $0x210] sm:$0xff] }
  0x67   :  { %1333 = vmatprep.subr.bf16.mxu1 %v1332_v31  ;;  %v152_v58 = vld [vmem:[#allocation5 + $0x230] sm:$0xff]  ;;  %v1288_v59 = vpack.c.bf16 %v175_v52, %v171_v51  ;;  %v174_v60 = vld [vmem:[#allocation5 + $0x2e0] sm:$0xff]  ;;  %v157_v61 = vld [vmem:[#allocation5 + $0x258] sm:$0xff] }
  0x68   :  { %1271 = vmatpush1.bf16.msra.mxu0 %v1270_v5  ;;  %v161_v62 = vld [vmem:[#allocation5 + $0x278] sm:$0xff]  ;;  %v179_v63 = vld [vmem:[#allocation5 + $0x308] sm:$0xff]  ;;  %v1342_v1 = vpack.c.bf16 %v152_v58, %v148_v57  ;;  %v1290_v2 = vpack.c.bf16 %v174_v60, %v170_v55  ;;  %v178_v3 = vld [vmem:[#allocation5 + $0x300] sm:$0xff] }
  0x69   :  { %1273 = vmatprep.subr.bf16.mxu0 %v1272_v10  ;;  %v183_v0 = vld [vmem:[#allocation5 + $0x328] sm:$0xff]  ;;  %v1344_v4 = vpack.c.bf16 %v161_v62, %v157_v61  ;;  %v156_v5 = vld [vmem:[#allocation5 + $0x250] sm:$0xff]  ;;  %v182_v8 = vld [vmem:[#allocation5 + $0x320] sm:$0xff] }
  0x6a   :  { %1335 = vmatpush1.bf16.msra.mxu1 %v1334_v41  ;;  %v160_v6 = vld [vmem:[#allocation5 + $0x270] sm:$0xff]  ;;  %v1292_v7 = vpack.c.bf16 %v183_v0, %v179_v63  ;;  %v165_v9 = vld [vmem:[#allocation5 + $0x298] sm:$0xff]  ;;  %v187_v11 = vld [vmem:[#allocation5 + $0x348] sm:$0xff]  ;;  %v1294_v14 = vpack.c.bf16 %v182_v8, %v178_v3 }
  0x6b   :  { %1337 = vmatprep.subr.bf16.mxu1 %v1336_v44  ;;  %v169_v10 = vld [vmem:[#allocation5 + $0x2b8] sm:$0xff]  ;;  %v191_v12 = vld [vmem:[#allocation5 + $0x368] sm:$0xff]  ;;  %v1346_v13 = vpack.c.bf16 %v160_v6, %v156_v5  ;;  %v186_v15 = vld [vmem:[#allocation5 + $0x340] sm:$0xff] }
  0x6c   :  { %1275 = vmatpush1.bf16.msra.mxu0 %v1274_v17  ;;  %v1348_v16 = vpack.c.bf16 %v169_v10, %v165_v9  ;;  %v164_v17 = vld [vmem:[#allocation5 + $0x290] sm:$0xff]  ;;  %v1296_v19 = vpack.c.bf16 %v191_v12, %v187_v11  ;;  %v190_v20 = vld [vmem:[#allocation5 + $0x360] sm:$0xff]  ;;  %v173_v21 = vld [vmem:[#allocation5 + $0x2d8] sm:$0xff] }
  0x6d   :  { %1277 = vmatprep.subr.bf16.mxu0 %v1276_v22  ;;  %v168_v18 = vld [vmem:[#allocation5 + $0x2b0] sm:$0xff]  ;;  %v177_v22 = vld [vmem:[#allocation5 + $0x2f8] sm:$0xff]  ;;  %v195_v23 = vld [vmem:[#allocation5 + $0x388] sm:$0xff]  ;;  %v1298_v26 = vpack.c.bf16 %v190_v20, %v186_v15 }
  0x6e   :  { %1339 = vmatpush1.bf16.msra.mxu1 %v1338_v53  ;;  %v199_v24 = vld [vmem:[#allocation5 + $0x3a8] sm:$0xff]  ;;  %v1350_v25 = vpack.c.bf16 %v168_v18, %v164_v17  ;;  %v194_v27 = vld [vmem:[#allocation5 + $0x380] sm:$0xff]  ;;  %v1352_v28 = vpack.c.bf16 %v177_v22, %v173_v21  ;;  %v172_v29 = vld [vmem:[#allocation5 + $0x2d0] sm:$0xff] }
  0x6f   :  { %1341 = vmatprep.subr.bf16.mxu1 %v1340_v56  ;;  %v1300_v31 = vpack.c.bf16 %v199_v24, %v195_v23  ;;  %v198_v32 = vld [vmem:[#allocation5 + $0x3a0] sm:$0xff]  ;;  %v181_v33 = vld [vmem:[#allocation5 + $0x318] sm:$0xff]  ;;  %v207_v36 = vld [vmem:[#allocation5 + $0x3e8] sm:$0xff] }
  0x70   :  { %1279 = vmatpush1.bf16.msra.mxu0 %v1278_v30  ;;  %v176_v30 = vld [vmem:[#allocation5 + $0x2f0] sm:$0xff]  ;;  %v185_v34 = vld [vmem:[#allocation5 + $0x338] sm:$0xff]  ;;  %v1302_v38 = vpack.c.bf16 %v198_v32, %v194_v27  ;;  %v202_v39 = vld [vmem:[#allocation5 + $0x3c0] sm:$0xff] }
  0x71   :  { %1281 = vmatprep.subr.bf16.mxu0 %v1280_v35  ;;  %v203_v35 = vld [vmem:[#allocation5 + $0x3c8] sm:$0xff]  ;;  %v1354_v37 = vpack.c.bf16 %v176_v30, %v172_v29  ;;  %v1356_v40 = vpack.c.bf16 %v185_v34, %v181_v33  ;;  %v180_v41 = vld [vmem:[#allocation5 + $0x310] sm:$0xff]  ;;  %v206_v44 = vld [vmem:[#allocation5 + $0x3e0] sm:$0xff] }
  0x72   :  { %1343 = vmatpush1.bf16.msra.mxu1 %v1342_v1  ;;  %v1304_v43 = vpack.c.bf16 %v207_v36, %v203_v35  ;;  %v189_v45 = vld [vmem:[#allocation5 + $0x358] sm:$0xff]  ;;  %v382_v48 = vld [vmem:[#allocation7 + $0x20] sm:$0xff]  ;;  %v1306_v50 = vpack.c.bf16 %v206_v44, %v202_v39  ;;  %v188_v52 = vld [vmem:[#allocation5 + $0x350] sm:$0xff] }
  0x73   :  { %1345 = vmatprep.subr.bf16.mxu1 %v1344_v4  ;;  %v193_v46 = vld [vmem:[#allocation5 + $0x378] sm:$0xff]  ;;  %v192_v53 = vld [vmem:[#allocation5 + $0x370] sm:$0xff]  ;;  %v378_v57 = vld [vmem:[#allocation7] sm:$0xff] }
  0x74   :  { %1283 = vmatpush1.bf16.msra.mxu0 %v1282_v42  ;;  %v184_v42 = vld [vmem:[#allocation5 + $0x330] sm:$0xff]  ;;  %v1360_v51 = vpack.c.bf16 %v193_v46, %v189_v45  ;;  %v201_v55 = vld [vmem:[#allocation5 + $0x3b8] sm:$0xff]  ;;  %v1362_v62 = vpack.c.bf16 %v192_v53, %v188_v52  ;;  %v391_v8 = vld [vmem:[#allocation7 + $0x68] sm:$0xff] }
  0x75   :  { %1285 = vmatprep.subr.bf16.mxu0 %v1284_v47  ;;  %v379_v47 = vld [vmem:[#allocation7 + $0x8] sm:$0xff]  ;;  %v1358_v49 = vpack.c.bf16 %v184_v42, %v180_v41  ;;  %v381_v58 = vld [vmem:[#allocation7 + $0x18] sm:$0xff]  ;;  %v388_v60 = vld [vmem:[#allocation7 + $0x50] sm:$0xff] }
  0x76   :  { %1347 = vmatpush1.bf16.msra.mxu1 %v1346_v13  ;;  %v1372_v56 = vpack.c.bf16 %v382_v48, %v379_v47  ;;  %v1874_v61 = vld [vmem:[#allocation2] sm:$0xff]  ;;  %v1374_v3 = vpack.c.bf16 %v381_v58, %v378_v57  ;;  %v209_v4 = vld [vmem:[#allocation5 + $0x3f8] sm:$0xff]  ;;  %v394_v9 = vld [vmem:[#allocation7 + $0x80] sm:$0xff] }
  0x77   :  { %1349 = vmatprep.subr.bf16.mxu1 %v1348_v16  ;;  %v196_v0 = vld [vmem:[#allocation5 + $0x390] sm:$0xff]  ;;  %v390_v15 = vld [vmem:[#allocation7 + $0x60] sm:$0xff]  ;;  %v1380_v16 = vpack.c.bf16 %v394_v9, %v391_v8  ;;  %v393_v17 = vld [vmem:[#allocation7 + $0x78] sm:$0xff] }
  0x78   :  { %1287 = vmatpush1.bf16.msra.mxu0 %v1286_v54  ;;  %v197_v54 = vld [vmem:[#allocation5 + $0x398] sm:$0xff]  ;;  %v200_v1 = vld [vmem:[#allocation5 + $0x3b0] sm:$0xff]  ;;  %v1382_v23 = vpack.c.bf16 %v393_v17, %v390_v15  ;;  %v383_v27 = vld [vmem:[#allocation7 + $0x28] sm:$0xff] }
  0x79   :  { %1289 = vmatprep.subr.bf16.mxu0 %v1288_v59  ;;  %v385_v59 = vld [vmem:[#allocation7 + $0x38] sm:$0xff]  ;;  %v1364_v63 = vpack.c.bf16 %v201_v55, %v197_v54  ;;  %v384_v6 = vld [vmem:[#allocation7 + $0x30] sm:$0xff]  ;;  %v1366_v10 = vpack.c.bf16 %v200_v1, %v196_v0  ;;  %v399_v29 = vld [vmem:[#allocation7 + $0xa8] sm:$0xff] }
  0x7a   :  { %1351 = vmatpush1.bf16.msra.mxu1 %v1350_v25  ;;  %v1376_v5 = vpack.c.bf16 %v388_v60, %v385_v59  ;;  %v204_v12 = vld [vmem:[#allocation5 + $0x3d0] sm:$0xff]  ;;  %v397_v20 = vld [vmem:[#allocation7 + $0x98] sm:$0xff]  ;;  %v434_v30 = vld [vmem:[#allocation7 + $0x1c0] sm:$0xff] }
  0x7b   :  { %1353 = vmatprep.subr.bf16.mxu1 %v1352_v28  ;;  %v208_v13 = vld [vmem:[#allocation5 + $0x3f0] sm:$0xff]  ;;  %v403_v32 = vld [vmem:[#allocation7 + $0xc8] sm:$0xff]  ;;  %v406_v33 = vld [vmem:[#allocation7 + $0xe0] sm:$0xff] }
  0x7c   :  { %1291 = vmatpush1.bf16.msra.mxu0 %v1290_v2  ;;  %v205_v2 = vld [vmem:[#allocation5 + $0x3d8] sm:$0xff]  ;;  %v428_v18 = vld [vmem:[#allocation7 + $0x190] sm:$0xff]  ;;  %v1370_v22 = vpack.c.bf16 %v208_v13, %v204_v12  ;;  %v402_v36 = vld [vmem:[#allocation7 + $0xc0] sm:$0xff] }
  0x7d   :  { %1293 = vmatprep.subr.bf16.mxu0 %v1292_v7  ;;  %v387_v7 = vld [vmem:[#allocation7 + $0x48] sm:$0xff]  ;;  %v1368_v11 = vpack.c.bf16 %v209_v4, %v205_v2  ;;  %v400_v21 = vld [vmem:[#allocation7 + $0xb0] sm:$0xff]  ;;  %v389_v39 = vld [vmem:[#allocation7 + $0x58] sm:$0xff] }
  0x7e   :  { %1355 = vmatpush1.bf16.msra.mxu1 %v1354_v37  ;;  %v396_v24 = vld [vmem:[#allocation7 + $0x90] sm:$0xff]  ;;  %v1384_v28 = vpack.c.bf16 %v400_v21, %v397_v20  ;;  %v405_v41 = vld [vmem:[#allocation7 + $0xd8] sm:$0xff]  ;;  %v411_v53 = vld [vmem:[#allocation7 + $0x108] sm:$0xff] }
  0x7f   :  { %1357 = vmatprep.subr.bf16.mxu1 %v1356_v40  ;;  %v1386_v35 = vpack.c.bf16 %v399_v29, %v396_v24  ;;  %v1388_v40 = vpack.c.bf16 %v406_v33, %v403_v32  ;;  %v440_v42 = vld [vmem:[#allocation7 + $0x1f0] sm:$0xff]  ;;  %v409_v44 = vld [vmem:[#allocation7 + $0xf8] sm:$0xff]  ;;  %v1390_v47 = vpack.c.bf16 %v405_v41, %v402_v36  ;;  %v446_v54 = vld [vmem:[#allocation7 + $0x220] sm:$0xff] }
  0x80   :  { %1295 = vmatpush1.bf16.msra.mxu0 %v1294_v14  ;;  %v1378_v14 = vpack.c.bf16 %v387_v7, %v384_v6  ;;  %v412_v45 = vld [vmem:[#allocation7 + $0x110] sm:$0xff]  ;;  %v449_v55 = vld [vmem:[#allocation7 + $0x238] sm:$0xff]  ;;  %v418_v57 = vld [vmem:[#allocation7 + $0x140] sm:$0xff] }
  0x81   :  { %1297 = vmatprep.subr.bf16.mxu0 %v1296_v19  ;;  %v431_v19 = vld [vmem:[#allocation7 + $0x1a8] sm:$0xff]  ;;  %v408_v48 = vld [vmem:[#allocation7 + $0xf0] sm:$0xff]  ;;  %v1392_v52 = vpack.c.bf16 %v412_v45, %v409_v44  ;;  %v414_v60 = vld [vmem:[#allocation7 + $0x120] sm:$0xff] }
  0x82   :  { %1359 = vmatpush1.bf16.msra.mxu1 %v1358_v49  ;;  %v1500_v25 = vpack.c.bf16 %v431_v19, %v428_v18  ;;  %v1394_v59 = vpack.c.bf16 %v411_v53, %v408_v48  ;;  %v417_v1 = vld [vmem:[#allocation7 + $0x138] sm:$0xff]  ;;  %v452_v2 = vld [vmem:[#allocation7 + $0x250] sm:$0xff]  ;;  %v427_v12 = vld [vmem:[#allocation7 + $0x188] sm:$0xff] }
  0x83   :  { %1361 = vmatprep.subr.bf16.mxu1 %v1360_v51  ;;  %v395_v51 = vld [vmem:[#allocation7 + $0x88] sm:$0xff]  ;;  %v421_v4 = vld [vmem:[#allocation7 + $0x158] sm:$0xff]  ;;  %v1398_v7 = vpack.c.bf16 %v417_v1, %v414_v60  ;;  %v430_v13 = vld [vmem:[#allocation7 + $0x1a0] sm:$0xff] }
  0x84   :  { %1299 = vmatpush1.bf16.msra.mxu0 %v1298_v26  ;;  %v380_v26 = vld [vmem:[#allocation7 + $0x10] sm:$0xff]  ;;  %v1404_v15 = vpack.c.bf16 %v430_v13, %v427_v12  ;;  %v429_v17 = vld [vmem:[#allocation7 + $0x198] sm:$0xff]  ;;  %v439_v24 = vld [vmem:[#allocation7 + $0x1e8] sm:$0xff] }
  0x85   :  { %1301 = vmatprep.subr.bf16.mxu0 %v1300_v31  ;;  %v437_v31 = vld [vmem:[#allocation7 + $0x1d8] sm:$0xff]  ;;  %v1502_v34 = vpack.c.bf16 %v383_v27, %v380_v26  ;;  %v436_v19 = vld [vmem:[#allocation7 + $0x1d0] sm:$0xff]  ;;  %v451_v36 = vld [vmem:[#allocation7 + $0x248] sm:$0xff] }
  0x86   :  { %1363 = vmatpush1.bf16.msra.mxu1 %v1362_v62  ;;  %v1504_v37 = vpack.c.bf16 %v437_v31, %v434_v30  ;;  %v398_v62 = vld [vmem:[#allocation7 + $0xa0] sm:$0xff]  ;;  %v433_v18 = vld [vmem:[#allocation7 + $0x1b8] sm:$0xff]  ;;  %v448_v31 = vld [vmem:[#allocation7 + $0x230] sm:$0xff] }
  0x87   :  { %1365 = vmatprep.subr.bf16.mxu1 %v1364_v63  ;;  %v401_v63 = vld [vmem:[#allocation7 + $0xb8] sm:$0xff]  ;;  %v1408_v21 = vpack.c.bf16 %v436_v19, %v433_v18  ;;  %v407_v44 = vld [vmem:[#allocation7 + $0xe8] sm:$0xff]  ;;  %v458_v48 = vld [vmem:[#allocation7 + $0x280] sm:$0xff] }
  0x88   :  { %1303 = vmatpush1.bf16.msra.mxu0 %v1302_v38  ;;  %v386_v38 = vld [vmem:[#allocation7 + $0x40] sm:$0xff]  ;;  %v1514_v6 = vpack.c.bf16 %v401_v63, %v398_v62  ;;  %v441_v29 = vld [vmem:[#allocation7 + $0x1f8] sm:$0xff]  ;;  %v464_v60 = vld [vmem:[#allocation7 + $0x2b0] sm:$0xff] }
  0x89   :  { %1305 = vmatprep.subr.bf16.mxu0 %v1304_v43  ;;  %v443_v43 = vld [vmem:[#allocation7 + $0x208] sm:$0xff]  ;;  %v1506_v46 = vpack.c.bf16 %v389_v39, %v386_v38  ;;  %v445_v30 = vld [vmem:[#allocation7 + $0x218] sm:$0xff]  ;;  %v462_v63 = vld [vmem:[#allocation7 + $0x2a0] sm:$0xff] }
  0x8a   :  { %1367 = vmatpush1.bf16.msra.mxu1 %v1366_v10  ;;  %v1508_v49 = vpack.c.bf16 %v443_v43, %v440_v42  ;;  %v420_v10 = vld [vmem:[#allocation7 + $0x150] sm:$0xff]  ;;  %v1416_v33 = vpack.c.bf16 %v448_v31, %v445_v30  ;;  %v453_v41 = vld [vmem:[#allocation7 + $0x258] sm:$0xff]  ;;  %v467_v62 = vld [vmem:[#allocation7 + $0x2c8] sm:$0xff] }
  0x8b   :  { %1369 = vmatprep.subr.bf16.mxu1 %v1368_v11  ;;  %v423_v11 = vld [vmem:[#allocation7 + $0x168] sm:$0xff]  ;;  %v404_v42 = vld [vmem:[#allocation7 + $0xd0] sm:$0xff]  ;;  %v1524_v1 = vpack.c.bf16 %v467_v62, %v464_v60  ;;  %v478_v19 = vld [vmem:[#allocation7 + $0x320] sm:$0xff] }
  0x8c   :  { %1307 = vmatpush1.bf16.msra.mxu0 %v1306_v50  ;;  %v392_v50 = vld [vmem:[#allocation7 + $0x70] sm:$0xff]  ;;  %v1518_v45 = vpack.c.bf16 %v407_v44, %v404_v42  ;;  %v471_v13 = vld [vmem:[#allocation7 + $0x2e8] sm:$0xff]  ;;  %v533_v44 = vld [vmem:[#allocation7 + $0x4d8] sm:$0xff] }
  0x8d   :  { %1373 = vmatprep.subr.bf16.mxu0 %v1372_v56  ;;  %v415_v56 = vld [vmem:[#allocation7 + $0x128] sm:$0xff]  ;;  %v1510_v58 = vpack.c.bf16 %v395_v51, %v392_v50  ;;  %v461_v50 = vld [vmem:[#allocation7 + $0x298] sm:$0xff]  ;;  %v456_v51 = vld [vmem:[#allocation7 + $0x270] sm:$0xff] }
  0x8e   :  { %1371 = vmatpush1.bf16.msra.mxu1 %v1370_v22  ;;  %v1396_v0 = vpack.c.bf16 %v418_v57, %v415_v56  ;;  %v432_v22 = vld [vmem:[#allocation7 + $0x1b0] sm:$0xff]  ;;  %v1520_v53 = vpack.c.bf16 %v461_v50, %v458_v48  ;;  %v413_v56 = vld [vmem:[#allocation7 + $0x118] sm:$0xff]  ;;  %v475_v18 = vld [vmem:[#allocation7 + $0x308] sm:$0xff] }
  0x8f   :  { %297 = vmatmul.mubr.f32.vlgmr.msra.gmra.mrb[0].mxu0 %v1874_v61  ;;  %1501 = vmatprep.subr.bf16.mxu1 %v1500_v25  ;;  %v442_v25 = vld [vmem:[#allocation7 + $0x200] sm:$0xff]  ;;  %v468_v12 = vld [vmem:[#allocation7 + $0x2d0] sm:$0xff]  ;;  %v483_v50 = vld [vmem:[#allocation7 + $0x348] sm:$0xff] }
  0x90   :  { %1375 = vmatpush1.bf16.msra.mxu0 %v1374_v3  ;;  %v455_v3 = vld [vmem:[#allocation7 + $0x268] sm:$0xff]  ;;  %v1412_v27 = vpack.c.bf16 %v442_v25, %v439_v24  ;;  %v212_v24 = vlaneseq  ;;  %v484_v42 = vld [vmem:[#allocation7 + $0x350] sm:$0xff] }
  0x91   :  { %1377 = vmatprep.subr.bf16.mxu0 %v1376_v5  ;;  %368 = vmatmul.mubr.f32.vlgmr.msra.gmra.mrb[0].mxu1 %v1874_v61  ;;  %v1512_v61 = vpack.c.bf16 %v449_v55, %v446_v54  ;;  %v424_v5 = vld [vmem:[#allocation7 + $0x170] sm:$0xff]  ;;  %v1516_v8 = vpack.c.bf16 %v455_v3, %v452_v2  ;;  %v410_v55 = vld [vmem:[#allocation7 + $0x100] sm:$0xff] }
  0x92   :  { %1503 = vmatpush3.bf16.msra.mxu1 %v1502_v34  ;;  %v1400_v9 = vpack.c.bf16 %v424_v5, %v421_v4  ;;  %v444_v34 = vld [vmem:[#allocation7 + $0x210] sm:$0xff]  ;;  %v1522_v57 = vpack.c.bf16 %v413_v56, %v410_v55  ;;  %v419_v4 = vld [vmem:[#allocation7 + $0x148] sm:$0xff]  ;;  %v469_v5 = vld [vmem:[#allocation7 + $0x2d8] sm:$0xff]  ;;  %v1878_v25 = vshrl.u32 %v212_v24, 7 }
  0x93   :  { %1505 = vmatprep.subr.bf16.mxu1 %v1504_v37  ;;  %v454_v37 = vld [vmem:[#allocation7 + $0x260] sm:$0xff]  ;;  %v416_v3 = vld [vmem:[#allocation7 + $0x130] sm:$0xff]  ;;  %v485_v56 = vld [vmem:[#allocation7 + $0x358] sm:$0xff] }
  0x94   :  { %1379 = vmatpush1.bf16.msra.mxu0 %v1378_v14  ;;  %v1402_v14 = vpack.c.bf16 %v423_v11, %v420_v10  ;;  %v1420_v39 = vpack.c.bf16 %v454_v37, %v451_v36  ;;  %v474_v36 = vld [vmem:[#allocation7 + $0x300] sm:$0xff]  ;;  %v477_v37 = vld [vmem:[#allocation7 + $0x318] sm:$0xff]  ;;  %v536_v60 = vld [vmem:[#allocation7 + $0x4f0] sm:$0xff] }
  0x95   :  { %1381 = vmatprep.subr.bf16.mxu0 %v1380_v16  ;;  %v426_v16 = vld [vmem:[#allocation7 + $0x180] sm:$0xff] }
  0x96   :  { %1507 = vmatpush3.bf16.msra.mxu1 %v1506_v46  ;;  %v1406_v20 = vpack.c.bf16 %v429_v17, %v426_v16  ;;  %v457_v46 = vld [vmem:[#allocation7 + $0x278] sm:$0xff]  ;;  %v482_v55 = vld [vmem:[#allocation7 + $0x340] sm:$0xff] }
  0x97   :  { %1509 = vmatprep.subr.bf16.mxu1 %v1508_v49  ;;  %v425_v16 = vld [vmem:[#allocation7 + $0x178] sm:$0xff] }
  0x98   :  { %1383 = vmatpush1.bf16.msra.mxu0 %v1382_v23  ;;  %v435_v23 = vld [vmem:[#allocation7 + $0x1c8] sm:$0xff] }
  0x99   :  { %1385 = vmatprep.subr.bf16.mxu0 %v1384_v28  ;;  %v1410_v26 = vpack.c.bf16 %v435_v23, %v432_v22  ;;  %v438_v28 = vld [vmem:[#allocation7 + $0x1e0] sm:$0xff]  ;;  %v527_v22 = vld [vmem:[#allocation7 + $0x4a8] sm:$0xff] }
  0x9a   :  { %1511 = vmatpush3.bf16.msra.mxu1 %v1510_v58  ;;  %v1414_v32 = vpack.c.bf16 %v441_v29, %v438_v28  ;;  %v463_v58 = vld [vmem:[#allocation7 + $0x2a8] sm:$0xff]  ;;  %v218_v28 = vsub.s32 1, %v1878_v25 }
  0x9b   :  { %1513 = vmatprep.subr.bf16.mxu1 %v1512_v61 }
  0x9c   :  { %1387 = vmatpush1.bf16.msra.mxu0 %v1386_v35  ;;  %v447_v35 = vld [vmem:[#allocation7 + $0x228] sm:$0xff] }
  0x9d   :  { %1389 = vmatprep.subr.bf16.mxu0 %v1388_v40  ;;  %v1418_v38 = vpack.c.bf16 %v447_v35, %v444_v34  ;;  %v450_v40 = vld [vmem:[#allocation7 + $0x240] sm:$0xff]  ;;  %v226_v35 = vsub.s32 3, %v1878_v25 }
  0x9e   :  { %1515 = vmatpush3.bf16.msra.mxu1 %v1514_v6  ;;  %v1422_v43 = vpack.c.bf16 %v453_v41, %v450_v40  ;;  %v1526_v6 = vpack.c.bf16 %v419_v4, %v416_v3  ;;  %v479_v40 = vld [vmem:[#allocation7 + $0x328] sm:$0xff]  ;;  %v481_v41 = vld [vmem:[#allocation7 + $0x338] sm:$0xff]  ;;  %v488_v4 = vld [vmem:[#allocation7 + $0x370] sm:$0xff] }
  0x9f   :  { %1517 = vmatprep.subr.bf16.mxu1 %v1516_v8  ;;  %v470_v8 = vld [vmem:[#allocation7 + $0x2e0] sm:$0xff] }
  0xa0   :  { %1391 = vmatpush1.bf16.msra.mxu0 %v1390_v47  ;;  %v460_v47 = vld [vmem:[#allocation7 + $0x290] sm:$0xff] }
  0xa1   :  { %1393 = vmatprep.subr.bf16.mxu0 %v1392_v52  ;;  %v1424_v49 = vpack.c.bf16 %v460_v47, %v457_v46  ;;  %v459_v52 = vld [vmem:[#allocation7 + $0x288] sm:$0xff]  ;;  %v1438_v47 = vpack.c.bf16 %v477_v37, %v474_v36  ;;  %v505_v36 = vld [vmem:[#allocation7 + $0x3f8] sm:$0xff] }
  0xa2   :  { %1519 = vmatpush3.bf16.msra.mxu1 %v1518_v45  ;;  %v1426_v54 = vpack.c.bf16 %v459_v52, %v456_v51 }
  0xa3   :  { %1521 = vmatprep.subr.bf16.mxu1 %v1520_v53  ;;  %v1440_v53 = vpack.c.bf16 %v484_v42, %v481_v41 }
  0xa4   :  { %1395 = vmatpush1.bf16.msra.mxu0 %v1394_v59  ;;  %v466_v59 = vld [vmem:[#allocation7 + $0x2c0] sm:$0xff] }
  0xa5   :  { %1397 = vmatprep.subr.bf16.mxu0 %v1396_v0  ;;  %v1428_v61 = vpack.c.bf16 %v466_v59, %v463_v58  ;;  %v465_v0 = vld [vmem:[#allocation7 + $0x2b8] sm:$0xff]  ;;  %v490_v59 = vld [vmem:[#allocation7 + $0x380] sm:$0xff] }
  0xa6   :  { %1523 = vmatpush3.bf16.msra.mxu1 %v1522_v57  ;;  %v1430_v2 = vpack.c.bf16 %v465_v0, %v462_v63  ;;  %v487_v57 = vld [vmem:[#allocation7 + $0x368] sm:$0xff]  ;;  %v1538_v63 = vpack.c.bf16 %v485_v56, %v482_v55  ;;  %v486_v0 = vld [vmem:[#allocation7 + $0x360] sm:$0xff] }
  0xa7   :  { %1525 = vmatprep.subr.bf16.mxu1 %v1524_v1  ;;  %v489_v1 = vld [vmem:[#allocation7 + $0x378] sm:$0xff]  ;;  %v510_v56 = vld [vmem:[#allocation7 + $0x420] sm:$0xff] }
  0xa8   :  { %1399 = vmatpush1.bf16.msra.mxu0 %v1398_v7  ;;  %v472_v7 = vld [vmem:[#allocation7 + $0x2f0] sm:$0xff] }
  0xa9   :  { %1401 = vmatprep.subr.bf16.mxu0 %v1400_v9  ;;  %v473_v9 = vld [vmem:[#allocation7 + $0x2f8] sm:$0xff]  ;;  %v1432_v10 = vpack.c.bf16 %v472_v7, %v469_v5  ;;  %v491_v5 = vld [vmem:[#allocation7 + $0x388] sm:$0xff]  ;;  %v496_v7 = vld [vmem:[#allocation7 + $0x3b0] sm:$0xff] }
  0xaa   :  { %v1528_v11 = vpack.c.bf16 %v473_v9, %v470_v8  ;;  %1527 = vmatpush3.bf16.msra.mxu1 %v1526_v6  ;;  %v493_v6 = vld [vmem:[#allocation7 + $0x398] sm:$0xff]  ;;  %v542_v8 = vld [vmem:[#allocation7 + $0x520] sm:$0xff] }
  0xab   :  { %v545_v9 = vld [vmem:[#allocation7 + $0x538] sm:$0xff] }
  0xac   :  { %1403 = vmatpush1.bf16.msra.mxu0 %v1402_v14  ;;  %v422_v14 = vld [vmem:[#allocation7 + $0x160] sm:$0xff]  ;;  %1529 = vmatprep.subr.bf16.mxu1 %v1528_v11  ;;  %v1542_v11 = vpack.c.bf16 %v491_v5, %v488_v4 }
  0xad   :  { %1405 = vmatprep.subr.bf16.mxu0 %v1404_v15  ;;  %v1434_v15 = vpack.c.bf16 %v471_v13, %v468_v12  ;;  %v1530_v17 = vpack.c.bf16 %v425_v16, %v422_v14  ;;  %v492_v12 = vld [vmem:[#allocation7 + $0x390] sm:$0xff]  ;;  %v495_v13 = vld [vmem:[#allocation7 + $0x3a8] sm:$0xff]  ;;  %v1448_v14 = vpack.c.bf16 %v496_v7, %v493_v6  ;;  %v494_v16 = vld [vmem:[#allocation7 + $0x3a0] sm:$0xff] }
  0xae   :  { %v1450_v24 = vpack.c.bf16 %v495_v13, %v492_v12  ;;  %v519_v6 = vld [vmem:[#allocation7 + $0x468] sm:$0xff]  ;;  %v518_v7 = vld [vmem:[#allocation7 + $0x460] sm:$0xff] }
  0xaf   :  { %1531 = vmatpush3.bf16.msra.mxu1 %v1530_v17  ;;  %v497_v17 = vld [vmem:[#allocation7 + $0x3b8] sm:$0xff] }
  0xb0   :  { %1407 = vmatpush1.bf16.msra.mxu0 %v1406_v20  ;;  %v524_v20 = vld [vmem:[#allocation7 + $0x490] sm:$0xff] }
  0xb1   :  { %1409 = vmatprep.subr.bf16.mxu0 %v1408_v21  ;;  %v1436_v21 = vpack.c.bf16 %v478_v19, %v475_v18  ;;  %v1532_v23 = vpack.c.bf16 %v527_v22, %v524_v20  ;;  %v499_v18 = vld [vmem:[#allocation7 + $0x3c8] sm:$0xff]  ;;  %v222_v19 = vsub.s32 2, %v1878_v25  ;;  %v502_v20 = vld [vmem:[#allocation7 + $0x3e0] sm:$0xff] }
  0xb2   :  { %v551_v22 = vld [vmem:[#allocation7 + $0x568] sm:$0xff] }
  0xb3   :  { %1533 = vmatprep.subr.bf16.mxu1 %v1532_v23 }
  0xb4   :  { %1411 = vmatpush1.bf16.msra.mxu0 %v1410_v26  ;;  %v214_v26 = vsub.s32 0, %v1878_v25  ;;  %v1784_v25 = vmov 0.0  }
  0xb5   :  { %1413 = vmatprep.subr.bf16.mxu0 %v1412_v27  ;;  %v1884_v27 = vld [vmem:[%s1936_s2] sm:$0xf] }
  0xb6   :  { %v215_v29 = vrot.slane %v1884_v27, %v214_v26  ;;  %v219_v30 = vrot.slane %v1884_v27, %v218_v28  ;;  %v223_v37 = vrot.slane %v1884_v27, %v222_v19 }
  0xb8   :  { %1415 = vmatpush1.bf16.msra.mxu0 %v1414_v32 }
  0xb9   :  { %1417 = vmatprep.subr.bf16.mxu0 %v1416_v33 }
  0xbc   :  { %1419 = vmatpush1.bf16.msra.mxu0 %v1418_v38  ;;  %v227_v38 = vrot.slane %v1884_v27, %v226_v35  ;;  %v503_v35 = vld [vmem:[#allocation7 + $0x3e8] sm:$0xff] }
  0xbd   :  { %1421 = vmatprep.subr.bf16.mxu0 %v1420_v39  ;;  %v476_v39 = vld [vmem:[#allocation7 + $0x310] sm:$0xff] }
  0xbe   :  { %v1534_v48 = vpack.c.bf16 %v479_v40, %v476_v39  ;;  %v554_v39 = vld [vmem:[#allocation7 + $0x580] sm:$0xff]  ;;  %v557_v40 = vld [vmem:[#allocation7 + $0x598] sm:$0xff] }
  0xc0   :  { %1423 = vmatpush1.bf16.msra.mxu0 %v1422_v43  ;;  %v530_v43 = vld [vmem:[#allocation7 + $0x4c0] sm:$0xff] }
  0xc1   :  { %1425 = vmatprep.subr.bf16.mxu0 %v1424_v49  ;;  %v480_v49 = vld [vmem:[#allocation7 + $0x330] sm:$0xff] }
  0xc2   :  { %v1442_v62 = vpack.c.bf16 %v483_v50, %v480_v49  ;;  %v509_v49 = vld [vmem:[#allocation7 + $0x418] sm:$0xff]  ;;  %v511_v50 = vld [vmem:[#allocation7 + $0x428] sm:$0xff] }
  0xc4   :  { %1427 = vmatpush1.bf16.msra.mxu0 %v1426_v54  ;;  %v1536_v54 = vpack.c.bf16 %v533_v44, %v530_v43  ;;  %v504_v43 = vld [vmem:[#allocation7 + $0x3f0] sm:$0xff]  ;;  %v507_v44 = vld [vmem:[#allocation7 + $0x408] sm:$0xff] }
  0xc5   :  { %1429 = vmatprep.subr.bf16.mxu0 %v1428_v61  ;;  %v539_v61 = vld [vmem:[#allocation7 + $0x508] sm:$0xff] }
  0xc6   :  { %v1540_v3 = vpack.c.bf16 %v539_v61, %v536_v60  ;;  %v512_v60 = vld [vmem:[#allocation7 + $0x430] sm:$0xff]  ;;  %v515_v61 = vld [vmem:[#allocation7 + $0x448] sm:$0xff] }
  0xc8   :  { %1431 = vmatpush1.bf16.msra.mxu0 %v1430_v2  ;;  %v1444_v2 = vpack.c.bf16 %v490_v59, %v487_v57  ;;  %v513_v57 = vld [vmem:[#allocation7 + $0x438] sm:$0xff] }
  0xc9   :  { %1433 = vmatprep.subr.bf16.mxu0 %v1432_v10  ;;  %v1446_v10 = vpack.c.bf16 %v489_v1, %v486_v0  ;;  %v566_v0 = vld [vmem:[#allocation7 + $0x5e0] sm:$0xff]  ;;  %v1462_v1 = vpack.c.bf16 %v513_v57, %v510_v56  ;;  %v561_v57 = vld [vmem:[#allocation7 + $0x5b8] sm:$0xff] }
  0xca   :  { %v558_v56 = vld [vmem:[#allocation7 + $0x5a0] sm:$0xff] }
  0xcc   :  { %1435 = vmatpush1.bf16.msra.mxu0 %v1434_v15  ;;  %v1544_v15 = vpack.c.bf16 %v545_v9, %v542_v8  ;;  %v521_v8 = vld [vmem:[#allocation7 + $0x478] sm:$0xff]  ;;  %v523_v9 = vld [vmem:[#allocation7 + $0x488] sm:$0xff] }
  0xcd   :  { %1437 = vmatprep.subr.bf16.mxu0 %v1436_v21  ;;  %v548_v21 = vld [vmem:[#allocation7 + $0x550] sm:$0xff]  ;;  %v1562_v12 = vpack.c.bf16 %v521_v8, %v518_v7 }
 0x162   :  { %v298_v31 = vpop.f32.mrb[0].mxu0 }
 0x163   :  { %v299_v32 = vadd.f32 %v298_v31, %v215_v29  ;;  %v300_v33 = vpop.f32.mrb[1].mxu0  ;;  %v1546_v29 = vpack.c.bf16 %v497_v17, %v494_v16  ;;  %v501_v31 = vld [vmem:[#allocation7 + $0x3d8] sm:$0xff]  ;;  %v532_v17 = vld [vmem:[#allocation7 + $0x4d0] sm:$0xff] }
 0x164   :  { %v301_v34 = vadd.f32 %v300_v33, %v219_v30  ;;  %v1895_v45 = vpop.f32.mrb[0].mxu1  ;;  %v498_v30 = vld [vmem:[#allocation7 + $0x3c0] sm:$0xff]  ;;  %v1548_v33 = vpack.c.bf16 %v551_v22, %v548_v21  ;;  %v529_v16 = vld [vmem:[#allocation7 + $0x4b8] sm:$0xff]  ;;  %v528_v22 = vld [vmem:[#allocation7 + $0x4b0] sm:$0xff] }
 0x165   :  { %v371_v46 = vpop.f32.mrb[1].mxu1  ;;  %v1454_v41 = vpack.c.bf16 %v501_v31, %v498_v30  ;;  %v370_v27 = vadd.f32 %v1895_v45, %v223_v37  ;;  %v569_v45 = vld [vmem:[#allocation7 + $0x5f8] sm:$0xff]  ;;  %v1472_v21 = vpack.c.bf16 %v532_v17, %v529_v16  ;;  %v877_v16 = vld [vmem:[#allocation8 + $0x28] sm:$0xff]  ;;  %v894_v17 = vld [vmem:[#allocation8 + $0xb0] sm:$0xff] }
 0x166   :  { %1638 = vtanh.f32 %v301_v34  ;;  %v372_v51 = vadd.f32 %v371_v46, %v227_v38  ;;  %v500_v34 = vld [vmem:[#allocation7 + $0x3d0] sm:$0xff]  ;;  %v1560_v5 = vpack.c.bf16 %v569_v45, %v566_v0  ;;  %v888_v45 = vld [vmem:[#allocation8 + $0x80] sm:$0xff] }
 0x167   :  { %1640 = vtanh.f32 %v299_v32  ;;  %v1452_v32 = vpack.c.bf16 %v502_v20, %v499_v18  ;;  %v508_v38 = vld [vmem:[#allocation7 + $0x410] sm:$0xff]  ;;  %v1550_v42 = vpack.c.bf16 %v503_v35, %v500_v34  ;;  %v541_v34 = vld [vmem:[#allocation7 + $0x518] sm:$0xff] }
 0x168   :  { %1642 = vtanh.f32 %v372_v51  ;;  %v1456_v46 = vpack.c.bf16 %v508_v38, %v505_v36  ;;  %v514_v51 = vld [vmem:[#allocation7 + $0x440] sm:$0xff]  ;;  %v544_v35 = vld [vmem:[#allocation7 + $0x530] sm:$0xff] }
 0x169   :  { %1644 = vtanh.f32 %v370_v27  ;;  %v1480_v37 = vpack.c.bf16 %v544_v35, %v541_v34  ;;  %v540_v38 = vld [vmem:[#allocation7 + $0x510] sm:$0xff] }
 0x16a   :  { %v552_v27 = vld [vmem:[#allocation7 + $0x570] sm:$0xff] }
 0x16b   :  { %v898_v35 = vld [vmem:[#allocation8 + $0xd0] sm:$0xff] }
 0x170   :  { %v1639_v52 = vpop.eup %1638 }
 0x171   :  { %v1641_v58 = vpop.eup %1640  ;;  %651 = vmatprep.mubr.f32.mxu0 %v1639_v52  ;;  %793 = vmatprep.mubr.f32.mxu1 %v1639_v52  ;;  %v560_v52 = vld [vmem:[#allocation7 + $0x5b0] sm:$0xff] }
 0x172   :  { %652 = vmatmul.mubr.f32.vlgmr.msra.gmra.mrb[2].mxu0 %v1641_v58  ;;  %794 = vmatmul.mubr.f32.vlgmr.msra.gmra.mrb[2].mxu1 %v1641_v58  ;;  %v1643_v23 = vpop.eup %1642  ;;  %v1460_v58 = vpack.c.bf16 %v514_v51, %v511_v50  ;;  %v555_v51 = vld [vmem:[#allocation7 + $0x588] sm:$0xff] }
 0x173   :  { %1439 = vmatpush1.bf16.msra.mxu0 %v1438_v47  ;;  %1535 = vmatpush3.bf16.msra.mxu1 %v1534_v48  ;;  %v1552_v47 = vpack.c.bf16 %v557_v40, %v554_v39  ;;  %v506_v48 = vld [vmem:[#allocation7 + $0x400] sm:$0xff]  ;;  %v1645_v18 = vpop.eup %1644  ;;  %v543_v39 = vld [vmem:[#allocation7 + $0x528] sm:$0xff] }
 0x174   :  { %1441 = vmatprep.subr.bf16.mxu0 %v1440_v53  ;;  %1537 = vmatprep.subr.bf16.mxu1 %v1536_v54  ;;  %v563_v53 = vld [vmem:[#allocation7 + $0x5c8] sm:$0xff]  ;;  %v1458_v54 = vpack.c.bf16 %v507_v44, %v504_v43  ;;  %v1554_v55 = vpack.c.bf16 %v509_v49, %v506_v48  ;;  %v546_v44 = vld [vmem:[#allocation7 + $0x540] sm:$0xff]  ;;  %v556_v48 = vld [vmem:[#allocation7 + $0x590] sm:$0xff] }
 0x175   :  { %863 = vmatprep.mubr.f32.mxu1 %v1643_v23  ;;  %722 = vmatprep.mubr.f32.mxu0 %v1643_v23  ;;  %v1556_v59 = vpack.c.bf16 %v563_v53, %v560_v52  ;;  %v531_v23 = vld [vmem:[#allocation7 + $0x4c8] sm:$0xff]  ;;  %v562_v53 = vld [vmem:[#allocation7 + $0x5c0] sm:$0xff] }
 0x176   :  { %v1474_v30 = vpack.c.bf16 %v531_v23, %v528_v22  ;;  %v547_v40 = vld [vmem:[#allocation7 + $0x548] sm:$0xff]  ;;  %v878_v22 = vld [vmem:[#allocation8 + $0x30] sm:$0xff]  ;;  %v879_v23 = vld [vmem:[#allocation8 + $0x38] sm:$0xff] }
 0x177   :  { %1443 = vmatpush1.bf16.msra.mxu0 %v1442_v62  ;;  %1539 = vmatpush3.bf16.msra.mxu1 %v1538_v63  ;;  %v517_v62 = vld [vmem:[#allocation7 + $0x458] sm:$0xff]  ;;  %v520_v63 = vld [vmem:[#allocation7 + $0x470] sm:$0xff]  ;;  %v559_v52 = vld [vmem:[#allocation7 + $0x5a8] sm:$0xff] }
 0x178   :  { %1445 = vmatprep.subr.bf16.mxu0 %v1444_v2  ;;  %1541 = vmatprep.subr.bf16.mxu1 %v1540_v3  ;;  %v1558_v2 = vpack.c.bf16 %v515_v61, %v512_v60  ;;  %v516_v3 = vld [vmem:[#allocation7 + $0x450] sm:$0xff]  ;;  %v1464_v4 = vpack.c.bf16 %v520_v63, %v517_v62  ;;  %v1494_v60 = vpack.c.bf16 %v561_v57, %v558_v56  ;;  %v567_v63 = vld [vmem:[#allocation7 + $0x5e8] sm:$0xff] }
 0x179   :  { %v564_v62 = vld [vmem:[#allocation7 + $0x5d0] sm:$0xff] }
 0x17a   :  { %v1498_v0 = vpack.c.bf16 %v567_v63, %v564_v62  ;;  %v570_v57 = vld [vmem:[%s1938_s4] sm:$0x7] }
 0x17b   :  { %1447 = vmatpush1.bf16.msra.mxu0 %v1446_v10  ;;  %1543 = vmatpush3.bf16.msra.mxu1 %v1542_v11  ;;  %v526_v10 = vld [vmem:[#allocation7 + $0x4a0] sm:$0xff]  ;;  %v1466_v11 = vpack.c.bf16 %v519_v6, %v516_v3  ;;  %v891_v6 = vld [vmem:[#allocation8 + $0x98] sm:$0xff] }
 0x17c   :  { %1449 = vmatprep.subr.bf16.mxu0 %v1448_v14  ;;  %1545 = vmatprep.subr.bf16.mxu1 %v1544_v15  ;;  %v1468_v13 = vpack.c.bf16 %v526_v10, %v523_v9  ;;  %v522_v14 = vld [vmem:[#allocation7 + $0x480] sm:$0xff]  ;;  %v525_v15 = vld [vmem:[#allocation7 + $0x498] sm:$0xff]  ;;  %v874_v9 = vld [vmem:[#allocation8 + $0x10] sm:$0xff] }
 0x17d   :  { %v1470_v20 = vpack.c.bf16 %v525_v15, %v522_v14  ;;  %v875_v10 = vld [vmem:[#allocation8 + $0x18] sm:$0xff]  ;;  %v876_v15 = vld [vmem:[#allocation8 + $0x20] sm:$0xff] }
 0x17f   :  { %1451 = vmatpush1.bf16.msra.mxu0 %v1450_v24  ;;  %1547 = vmatpush3.bf16.msra.mxu1 %v1546_v29  ;;  %v535_v24 = vld [vmem:[#allocation7 + $0x4e8] sm:$0xff]  ;;  %v538_v29 = vld [vmem:[#allocation7 + $0x500] sm:$0xff] }
 0x180   :  { %1453 = vmatprep.subr.bf16.mxu0 %v1452_v32  ;;  %1549 = vmatprep.subr.bf16.mxu1 %v1548_v33  ;;  %v1476_v31 = vpack.c.bf16 %v538_v29, %v535_v24  ;;  %v534_v32 = vld [vmem:[#allocation7 + $0x4e0] sm:$0xff]  ;;  %v537_v33 = vld [vmem:[#allocation7 + $0x4f8] sm:$0xff]  ;;  %v897_v29 = vld [vmem:[#allocation8 + $0xc8] sm:$0xff] }
 0x181   :  { %v1478_v36 = vpack.c.bf16 %v537_v33, %v534_v32  ;;  %v896_v24 = vld [vmem:[#allocation8 + $0xc0] sm:$0xff]  ;;  %v881_v33 = vld [vmem:[#allocation8 + $0x48] sm:$0xff] }
 0x182   :  { %v880_v32 = vld [vmem:[#allocation8 + $0x40] sm:$0xff] }
 0x183   :  { %1455 = vmatpush1.bf16.msra.mxu0 %v1454_v41  ;;  %1551 = vmatpush3.bf16.msra.mxu1 %v1550_v42  ;;  %v550_v41 = vld [vmem:[#allocation7 + $0x560] sm:$0xff]  ;;  %v1482_v42 = vpack.c.bf16 %v543_v39, %v540_v38  ;;  %v1582_v34 = vpack.c.bf16 %v881_v33, %v880_v32  ;;  %v882_v38 = vld [vmem:[#allocation8 + $0x50] sm:$0xff]  ;;  %v883_v39 = vld [vmem:[#allocation8 + $0x58] sm:$0xff] }
 0x184   :  { %1457 = vmatprep.subr.bf16.mxu0 %v1456_v46  ;;  %1553 = vmatprep.subr.bf16.mxu1 %v1552_v47  ;;  %v1484_v43 = vpack.c.bf16 %v550_v41, %v547_v40  ;;  %v549_v46 = vld [vmem:[#allocation7 + $0x558] sm:$0xff]  ;;  %v1586_v40 = vpack.c.bf16 %v883_v39, %v882_v38  ;;  %v900_v41 = vld [vmem:[#allocation8 + $0xe0] sm:$0xff] }
 0x185   :  { %v553_v47 = vld [vmem:[#allocation7 + $0x578] sm:$0xff]  ;;  %v1486_v49 = vpack.c.bf16 %v549_v46, %v546_v44  ;;  %v885_v46 = vld [vmem:[#allocation8 + $0x68] sm:$0xff] }
 0x186   :  { %v1488_v50 = vpack.c.bf16 %v556_v48, %v553_v47  ;;  %v902_v47 = vld [vmem:[#allocation8 + $0xf0] sm:$0xff]  ;;  %v903_v48 = vld [vmem:[#allocation8 + $0xf8] sm:$0xff] }
 0x187   :  { %1459 = vmatpush1.bf16.msra.mxu0 %v1458_v54  ;;  %1555 = vmatpush3.bf16.msra.mxu1 %v1554_v55  ;;  %v1490_v54 = vpack.c.bf16 %v555_v51, %v552_v27  ;;  %v1492_v55 = vpack.c.bf16 %v562_v53, %v559_v52  ;;  %v886_v27 = vld [vmem:[#allocation8 + $0x70] sm:$0xff]  ;;  %v887_v51 = vld [vmem:[#allocation8 + $0x78] sm:$0xff]  ;;  %v1782_v53 = vmov 0.0|0.0  }
 0x188   :  { %1461 = vmatprep.subr.bf16.mxu0 %v1460_v58  ;;  %1557 = vmatprep.subr.bf16.mxu1 %v1556_v59  ;;  %v565_v58 = vld [vmem:[#allocation7 + $0x5d8] sm:$0xff]  ;;  %v568_v59 = vld [vmem:[#allocation7 + $0x5f0] sm:$0xff]  ;;  %v1594_v52 = vpack.c.bf16 %v887_v51, %v886_v27 }
 0x189   :  { %v1496_v61 = vpack.c.bf16 %v568_v59, %v565_v58  ;;  %v583_v58 = vrot.slane %v570_v57, %v222_v19 }
 0x18b   :  { %1463 = vmatpush1.bf16.msra.mxu0 %v1462_v1  ;;  %1559 = vmatpush3.bf16.msra.mxu1 %v1558_v2  ;;  %v889_v1 = vld [vmem:[#allocation8 + $0x88] sm:$0xff]  ;;  %v872_v2 = vld [vmem:[#allocation8] sm:$0xff] }
 0x18c   :  { %1465 = vmatprep.subr.bf16.mxu0 %v1464_v4  ;;  %1561 = vmatprep.subr.bf16.mxu1 %v1560_v5  ;;  %v1564_v3 = vpack.c.bf16 %v889_v1, %v888_v45  ;;  %v873_v4 = vld [vmem:[#allocation8 + $0x8] sm:$0xff]  ;;  %v890_v5 = vld [vmem:[#allocation8 + $0x90] sm:$0xff]  ;;  %v579_v45 = vrot.slane %v570_v57, %v218_v28  ;;  %v908_v28 = vld [vmem:[#allocation8 + $0x120] sm:$0xff] }
 0x18d   :  { %v1566_v7 = vpack.c.bf16 %v873_v4, %v872_v2  ;;  %v1568_v8 = vpack.c.bf16 %v891_v6, %v890_v5  ;;  %v904_v5 = vld [vmem:[#allocation8 + $0x100] sm:$0xff]  ;;  %v905_v6 = vld [vmem:[#allocation8 + $0x108] sm:$0xff] }
 0x18e   :  { %v1597_v19 = vpack.c.bf16 %v905_v6, %v904_v5 }
 0x18f   :  { %1467 = vmatpush1.bf16.msra.mxu0 %v1466_v11  ;;  %1563 = vmatpush3.bf16.msra.mxu1 %v1562_v12  ;;  %v892_v11 = vld [vmem:[#allocation8 + $0xa0] sm:$0xff]  ;;  %v893_v12 = vld [vmem:[#allocation8 + $0xa8] sm:$0xff] }
 0x190   :  { %1469 = vmatprep.subr.bf16.mxu0 %v1468_v13  ;;  %1565 = vmatprep.subr.bf16.mxu1 %v1564_v3  ;;  %v1570_v13 = vpack.c.bf16 %v875_v10, %v874_v9  ;;  %v1572_v14 = vpack.c.bf16 %v893_v12, %v892_v11  ;;  %v907_v9 = vld [vmem:[#allocation8 + $0x118] sm:$0xff]  ;;  %v909_v11 = vld [vmem:[#allocation8 + $0x128] sm:$0xff] }
 0x191   :  { %v1603_v12 = vpack.c.bf16 %v909_v11, %v908_v28 }
 0x192   :  { %864 = vmatmul.mubr.f32.vlgmr.msra.gmra.mrb[4].mxu1 %v1645_v18 }
 0x193   :  { %1471 = vmatpush1.bf16.msra.mxu0 %v1470_v20  ;;  %1567 = vmatpush3.bf16.msra.mxu1 %v1566_v7  ;;  %v1574_v20 = vpack.c.bf16 %v877_v16, %v876_v15  ;;  %v912_v16 = vld [vmem:[#allocation8 + $0x140] sm:$0xff] }
 0x194   :  { %1473 = vmatprep.subr.bf16.mxu0 %v1472_v21  ;;  %1569 = vmatprep.subr.bf16.mxu1 %v1568_v8  ;;  %v906_v8 = vld [vmem:[#allocation8 + $0x110] sm:$0xff] }
 0x197   :  { %1475 = vmatpush1.bf16.msra.mxu0 %v1474_v30  ;;  %1571 = vmatpush3.bf16.msra.mxu1 %v1570_v13  ;;  %v1578_v30 = vpack.c.bf16 %v879_v23, %v878_v22  ;;  %v910_v13 = vld [vmem:[#allocation8 + $0x130] sm:$0xff]  ;;  %v916_v23 = vld [vmem:[#allocation8 + $0x160] sm:$0xff] }
 0x198   :  { %1477 = vmatprep.subr.bf16.mxu0 %v1476_v31  ;;  %1573 = vmatprep.subr.bf16.mxu1 %v1572_v14  ;;  %v1580_v31 = vpack.c.bf16 %v897_v29, %v896_v24  ;;  %v911_v14 = vld [vmem:[#allocation8 + $0x138] sm:$0xff]  ;;  %v917_v24 = vld [vmem:[#allocation8 + $0x168] sm:$0xff] }
 0x199   :  { %v1606_v15 = vpack.c.bf16 %v911_v14, %v910_v13  ;;  %v1615_v29 = vpack.c.bf16 %v917_v24, %v916_v23 }
 0x19b   :  { %1479 = vmatpush1.bf16.msra.mxu0 %v1478_v36  ;;  %1575 = vmatpush3.bf16.msra.mxu1 %v1574_v20  ;;  %v899_v36 = vld [vmem:[#allocation8 + $0xd8] sm:$0xff]  ;;  %v914_v20 = vld [vmem:[#allocation8 + $0x150] sm:$0xff] }
 0x19c   :  { %1481 = vmatprep.subr.bf16.mxu0 %v1480_v37  ;;  %v1584_v37 = vpack.c.bf16 %v899_v36, %v898_v35 }
 0x19f   :  { %1483 = vmatpush1.bf16.msra.mxu0 %v1482_v42  ;;  %v901_v42 = vld [vmem:[#allocation8 + $0xe8] sm:$0xff] }
 0x1a0   :  { %1485 = vmatprep.subr.bf16.mxu0 %v1484_v43  ;;  %v884_v43 = vld [vmem:[#allocation8 + $0x60] sm:$0xff]  ;;  %v1588_v44 = vpack.c.bf16 %v901_v42, %v900_v41 }
 0x1a3   :  { %1487 = vmatpush1.bf16.msra.mxu0 %v1486_v49  ;;  %v1590_v49 = vpack.c.bf16 %v885_v46, %v884_v43 }
 0x1a4   :  { %1489 = vmatprep.subr.bf16.mxu0 %v1488_v50  ;;  %v1592_v50 = vpack.c.bf16 %v903_v48, %v902_v47 }
 0x1a7   :  { %1491 = vmatpush1.bf16.msra.mxu0 %v1490_v54 }
 0x1a8   :  { %1493 = vmatprep.subr.bf16.mxu0 %v1492_v55 }
 0x1ab   :  { %1495 = vmatpush1.bf16.msra.mxu0 %v1494_v60 }
 0x1ac   :  { %1497 = vmatprep.subr.bf16.mxu0 %v1496_v61 }
 0x1af   :  { %1499 = vmatpush1.bf16.msra.mxu0 %v1498_v0  ;;  %v575_v0 = vrot.slane %v570_v57, %v214_v26  ;;  %v1600_v26 = vpack.c.bf16 %v907_v9, %v906_v8 }
 0x1b2   :  { %723 = vmatmul.mubr.f32.vlgmr.msra.gmra.mrb[2].mxu0 %v1645_v18  ;;  %v895_v18 = vld [vmem:[#allocation8 + $0xb8] sm:$0xff] }
 0x1b3   :  { %v1576_v21 = vpack.c.bf16 %v895_v18, %v894_v17  ;;  %v913_v17 = vld [vmem:[#allocation8 + $0x148] sm:$0xff] }
 0x1b4   :  { %v1609_v18 = vpack.c.bf16 %v913_v17, %v912_v16 }
 0x1b5   :  { %1577 = vmatprep.subr.bf16.mxu1 %v1576_v21  ;;  %v915_v21 = vld [vmem:[#allocation8 + $0x158] sm:$0xff] }
 0x1b6   :  { %1579 = vmatpush3.bf16.msra.mxu1 %v1578_v30  ;;  %v1612_v22 = vpack.c.bf16 %v915_v21, %v914_v20  ;;  %v918_v30 = vld [vmem:[#allocation8 + $0x170] sm:$0xff] }
 0x1b7   :  { %1581 = vmatprep.subr.bf16.mxu1 %v1580_v31  ;;  %v919_v31 = vld [vmem:[#allocation8 + $0x178] sm:$0xff] }
 0x1b8   :  { %v1618_v32 = vpack.c.bf16 %v919_v31, %v918_v30 }
 0x1ba   :  { %1583 = vmatpush3.bf16.msra.mxu1 %v1582_v34 }
 0x1bb   :  { %1585 = vmatprep.subr.bf16.mxu1 %v1584_v37  ;;  %v1086_v37 = vld [vmem:[%s1940_s6] ss:$0 sm:$0xff] }
 0x1be   :  { %1587 = vmatpush3.bf16.msra.mxu1 %v1586_v40 }
 0x1bf   :  { %1589 = vmatprep.subr.bf16.mxu1 %v1588_v44 }
 0x1c2   :  { %1591 = vmatpush3.bf16.msra.mxu1 %v1590_v49 }
 0x1c3   :  { %1593 = vmatprep.subr.bf16.mxu1 %v1592_v50 }
 0x1c6   :  { %1595 = vmatpush3.bf16.msra.mxu1 %v1594_v52 }
 0x1c7   :  { %1596 = vmatprep.subr.bf16.mxu1 %v1782_v53 }
 0x245   :  { %v1119_v54 = vpop.f32.mrb[2].mxu1 }
 0x246   :  { %v1120_v55 = vpop.f32.mrb[3].mxu1 }
 0x247   :  { %v1121_v56 = vadd.f32 %v1120_v55, %v1119_v54 }
 0x249   :  { %v796_v61 = vadd.f32 %v1121_v56, %v583_v58 }
 0x265   :  { %v1154_v59 = vpop.f32.mrb[4].mxu1 }
 0x266   :  { %v1155_v60 = vpop.f32.mrb[5].mxu1 }
 0x267   :  { %v1156_v62 = vadd.f32 %v1155_v60, %v1154_v59 }
 0x269   :  { %v866_v63 = vadd.f32 %v1156_v62, %v796_v61 }
 0x285   :  { %v724_v1 = vpop.f32.mrb[2].mxu0 }
 0x286   :  { %v1620_v2 = vadd.f32 %v724_v1, %v575_v0  ;;  %v726_v3 = vpop.f32.mrb[3].mxu0 }
 0x287   :  { %v1621_v4 = vadd.f32 %v726_v3, %v579_v45 }
 0x289   :  { %1646 = vtanh.f32 %v1621_v4 }
 0x28a   :  { %1648 = vtanh.f32 %v1620_v2 }
 0x28b   :  { %1650 = vtanh.f32 %v866_v63 }
 0x293   :  { %v1647_v7 = vpop.eup %1646 }
 0x294   :  { %v1649_v10 = vpop.eup %1648  ;;  %991 = vmatprep.mubr.f32.mxu1 %v1647_v7 }
 0x295   :  { %992 = vmatmul.mubr.f32.vlgmr.msra.gmra.mrb[6].mxu1 %v1649_v10  ;;  %v1651_v33 = vpop.eup %1650 }
 0x296   :  { %1598 = vmatpush3.bf16.msra.mxu1 %v1597_v19  ;;  %1241 = vmatprep.mubr.msk.f32.mxu1 %vm1783_vm0, %v1784_v25 }
 0x297   :  { %1599 = vmatprep.subr.bf16.mxu1 %v1782_v53 }
 0x29a   :  { %1601 = vmatpush3.bf16.msra.mxu1 %v1600_v26 }
 0x29b   :  { %1602 = vmatprep.subr.bf16.mxu1 %v1782_v53 }
 0x29e   :  { %1604 = vmatpush3.bf16.msra.mxu1 %v1603_v12 }
 0x29f   :  { %1605 = vmatprep.subr.bf16.mxu1 %v1782_v53 }
 0x2a2   :  { %1607 = vmatpush3.bf16.msra.mxu1 %v1606_v15 }
 0x2a3   :  { %1608 = vmatprep.subr.bf16.mxu1 %v1782_v53 }
 0x2a6   :  { %1610 = vmatpush3.bf16.msra.mxu1 %v1609_v18 }
 0x2a7   :  { %1611 = vmatprep.subr.bf16.mxu1 %v1782_v53 }
 0x2aa   :  { %1613 = vmatpush3.bf16.msra.mxu1 %v1612_v22 }
 0x2ab   :  { %1614 = vmatprep.subr.bf16.mxu1 %v1782_v53 }
 0x2ae   :  { %1616 = vmatpush3.bf16.msra.mxu1 %v1615_v29 }
 0x2af   :  { %1617 = vmatprep.subr.bf16.mxu1 %v1782_v53 }
 0x2b2   :  { %1619 = vmatpush3.bf16.msra.mxu1 %v1618_v32 }
 0x2b5   :  { %1242 = vmatmul.mubr.f32.vlgmr.msra.gmra.mrb[8].mxu1 %v1651_v33 }
 0x368   :  { %v1189_v34 = vpop.f32.mrb[6].mxu1 }
 0x369   :  { %v1190_v35 = vpop.f32.mrb[7].mxu1 }
 0x36a   :  { %v1191_v36 = vadd.f32 %v1190_v35, %v1189_v34 }
 0x36c   :  { %v994_v38 = vadd.f32 %v1191_v36, %v1086_v37 }
 0x388   :  { %v1063_v39 = vpop.f32.mrb[8].mxu1 }
 0x389   :  { %v1064_v40 = vadd.f32 %v1063_v39, %v994_v38  ;;  %v1243_v41 = vpop.f32.mrb[9].mxu1 }
 0x38b   :  { %1652 = vtanh.f32 %v1064_v40 }
 0x395   :  { %v1653_v42 = vpop.eup %1652 }
 0x396   :  { %1068 = vst [vmem:[#allocation10] sm:$0xff] %v1653_v42 }
 0x397   :  { %1753 = shalt.err (!%p1750_p8)
}
 0x398   :  { %s1754_s6 = scalar_lea.hbm %s1941_s7, 128 }
 0x399   :  { %p1755_p9 = scmp.ne.s32.totalorder %s1941_s7, %s1754_s6  ;;  %p1758_p10 = scmp.lt.u32.totalorder %s1754_s6, %s1941_s7 }
 0x39b   :  { %p1760_p11 = pnand %p1758_p10, %p1755_p9 }
 0x39d   :  { %1763 = shalt.err (!%p1760_p11)
}
 0x39e   :  { %1078 = dma.vmem_to_hbm [thread:$0]  %s1076_s9, 128, %s1941_s7, [#allocation4]  }
 0x39f   :  { %1770 = dma.done.wait [#allocation4], 128  }
 0x3a0   :  { %1771 = vsyncadd [#allocation4], 4294967168 }
 0x3a1   :  { %1082 = vsyncpa [#allocation3], 1 }
 0x3a2   :  { %1083 = vsyncpa [#allocation6], 1 }
 0x3a3   :  { %1084 = vsyncpa [#allocation9], 1 }
 0x3a4   :  { %1085 = vsyncpa [#allocation4], 1 }

</bundles_post_ra>
